<compile_context>
chip_gen: v7x
topology: tpu7x:2x2x1
jax: 0.10.0
libtpu: 0.0.40
codegen_flags: <defaults>
</compile_context>

<pallas_src>
import jax
import jax.numpy as jnp
from jax.experimental import pallas as pl
from jax.experimental.pallas import tpu as pltpu


def rnn_decoder_kernel(dec_ref, wih_ref, b_ref, whh_ref,
                       wfc_ref, bfc_ref, wfh_ref, encb_ref, out_ref):
    """Single-invocation kernel (no grid): everything lives in VMEM.

    dec_ref : (T, F*L)        LSTM input, seq-major / feature-major flattened
    wih_ref : (F*L, 4*F*E)    feature-block-diagonal, gate-major W_ih', 0.5-scaled
    b_ref   : (1, 4*F*E)      (b_ih + b_hh) replicated per feature, 0.5-scaled
    whh_ref : (F*E, 4*F*E)    feature-block-diagonal, gate-major W_hh', 0.5-scaled
    wfc_ref : (F*E, H)        rnn_fc weight^T
    bfc_ref : (1, H)
    wfh_ref : (H, Cp)         final_layer weight^T, hidden part, lane-padded
    encb_ref: (T, Cp)         enc_out @ W_fin_enc^T + b_fin (hoisted), lane-padded
    out_ref : (T, Cp)
    """
    T = dec_ref.shape[0]
    FE = whh_ref.shape[0]                       # F * E (128)

    # --- Input projection for ALL T steps in one MXU launch (off the serial
    # h/c dependency chain); bias and the sigmoid 0.5 pre-scale are already
    # folded into wih_ref / b_ref on the host.
    pre = (jnp.dot(dec_ref[...], wih_ref[...],
                   preferred_element_type=jnp.float32)
           + b_ref[...])                                          # (T, 4*F*E)

    whh = whh_ref[...]                                            # (FE, 4FE)

    h = jnp.zeros((1, FE), jnp.float32)
    c = jnp.zeros((1, FE), jnp.float32)
    hs = []

    # --- Fully unrolled recurrence (T static).  PyTorch gate order i, f, g, o.
    # TODO(synk): W_hh' could be kept resident across the 8 steps with explicit
    # pltpu.matmul_push_rhs / matmul_acc_lhs / matmul_pop if the bundle dump
    # shows Mosaic re-loading the RHS every step.
    # TODO(synk): for strict f32 parity with PyTorch, set
    # precision=jax.lax.Precision.HIGHEST on this dot (kept at default here to
    # match the pure-JAX reference lowering).
    for t in range(T):
        gates = pre[t:t + 1, :] + jnp.dot(
            h, whh, preferred_element_type=jnp.float32)           # (1, 4FE)
        # One EUP pass over all four gates; i/f/o lanes were pre-scaled by 0.5
        # so sigmoid(x) = 0.5 * tanh(x/2) + 0.5 needs only a scalar affine.
        tg = jnp.tanh(gates)
        i_g = 0.5 * tg[:, 0 * FE:1 * FE] + 0.5
        f_g = 0.5 * tg[:, 1 * FE:2 * FE] + 0.5
        g_g = tg[:, 2 * FE:3 * FE]
        o_g = 0.5 * tg[:, 3 * FE:4 * FE] + 0.5
        c = f_g * c + i_g * g_g
        h = o_g * jnp.tanh(c)
        hs.append(h)                                              # registers

    # --- hidden.view(T, F*E) @ rnn_fc.weight^T + bias: the flattened h layout
    # already matches the PyTorch view ordering, so this is one MXU launch.
    hid_all = jnp.concatenate(hs, axis=0)                         # (T, FE)
    fc = (jnp.dot(hid_all, wfc_ref[...],
                  preferred_element_type=jnp.float32)
          + bfc_ref[...])                                         # (T, H)

    # final_layer on the concat == (hoisted enc partial) + fc @ W_fin_hid^T.
    out = encb_ref[...] + jnp.dot(fc, wfh_ref[...],
                                  preferred_element_type=jnp.float32)
    # TODO(synk): nn.Dropout(rate) is identity at inference; training-mode
    # random mask is not applied here.
    out_ref[...] = out.astype(out_ref.dtype)


def rnn_decoder_forward(enc_out, dec_inp, params):
    T, F, L = dec_inp.shape
    E = params["w_hh"].shape[1]
    H = params["w_fc"].shape[0]
    C = params["w_fin"].shape[0]
    ENC = enc_out.shape[1]
    FE = F * E
    C_pad = -(-C // 128) * 128                   # lane-dense output width
    f32 = jnp.float32

    # 0.5 pre-scale for sigmoid gates (i, f, o); 1.0 for the tanh gate (g).
    gate_scale = jnp.repeat(jnp.array([0.5, 0.5, 1.0, 0.5], f32), FE)  # (4FE,)

    def gate_major_block_diag(w_t):
        # w_t: (K, 4E)  ->  (F*K, 4*F*E): block-diagonal over the feature axis,
        # gate-major / feature-major columns, matching the flattened h layout.
        K = w_t.shape[0]
        w_g = w_t.reshape(K, 4, E).astype(f32)
        out = jnp.zeros((F, K, 4, F, E), f32)
        for f in range(F):
            out = out.at[f, :, :, f, :].set(w_g)
        return out.reshape(F * K, 4 * FE)

    wih_s = gate_major_block_diag(params["w_ih"].T) * gate_scale[None, :]
    whh_s = gate_major_block_diag(params["w_hh"].T) * gate_scale[None, :]
    b = params["b_ih"] + params["b_hh"]                            # (4E,)
    b_s = (jnp.broadcast_to(b.reshape(4, 1, E), (4, F, E)).reshape(4 * FE)
           * gate_scale)[None, :]                                  # (1, 4FE)

    wfc_t = params["w_fc"].T                                       # (FE, H)
    bfc = params["b_fc"][None, :]                                  # (1, H)

    wfin_t = params["w_fin"].T                                     # (ENC+H, C)
    # Encoder branch hoisted out of the kernel (independent of recurrent state;
    # XLA overlaps it with the pallas_call).  Pad class dim to 128 lanes.
    enc_part = enc_out @ wfin_t[:ENC, :] + params["b_fin"][None, :]  # (T, C)
    encb_pad = jnp.zeros((T, C_pad), f32).at[:, :C].set(enc_part)
    wfh_pad = jnp.zeros((H, C_pad), f32).at[:, :C].set(wfin_t[ENC:, :])

    dec2 = dec_inp.reshape(T, F * L)                               # (T, F*L)

    # TODO(synk): if this decoder is invoked repeatedly (per batch / beam),
    # add a leading "parallel" grid axis over independent sequences to
    # amortize per-call overhead and use both v7x TensorCores.
    vmem = pl.BlockSpec(memory_space=pltpu.MemorySpace.VMEM)
    out = pl.pallas_call(
        rnn_decoder_kernel,
        out_shape=jax.ShapeDtypeStruct((T, C_pad), f32),
        in_specs=[vmem] * 8,
        out_specs=vmem,
    )(dec2, wih_s, b_s, whh_s, wfc_t, bfc, wfh_pad, encb_pad)
    return out[:, :C]


def reference(enc_out, dec_inp, p):
    """Pure-JAX replica of the PyTorch forward (eval mode) for verification."""
    T, F, L = dec_inp.shape
    E = p["w_hh"].shape[1]
    h = jnp.zeros((F, E), jnp.float32)
    c = jnp.zeros((F, E), jnp.float32)
    outs = []
    for t in range(T):
        gates = (dec_inp[t] @ p["w_ih"].T + h @ p["w_hh"].T
                 + p["b_ih"] + p["b_hh"])
        i = jax.nn.sigmoid(gates[:, :E])
        f = jax.nn.sigmoid(gates[:, E:2 * E])
        g = jnp.tanh(gates[:, 2 * E:3 * E])
        o = jax.nn.sigmoid(gates[:, 3 * E:])
        c = f * c + i * g
        h = o * jnp.tanh(c)
        outs.append(h)
    hid = jnp.stack(outs, axis=0).reshape(T, F * E)
    fc = hid @ p["w_fc"].T + p["b_fc"]
    concat = jnp.concatenate([enc_out, fc], axis=1)
    return concat @ p["w_fin"].T + p["b_fin"]


def init_params(key, L, E, H, F, C, ENC):
    ks = jax.random.split(key, 8)

    def u(k, shape, fan_in):
        s = 1.0 / float(fan_in) ** 0.5
        return jax.random.uniform(k, shape, jnp.float32, -s, s)

    return {
        # nn.LSTM(max_len, embedding_dim)
        "w_ih": u(ks[0], (4 * E, L), E),
        "w_hh": u(ks[1], (4 * E, E), E),
        "b_ih": u(ks[2], (4 * E,), E),
        "b_hh": u(ks[3], (4 * E,), E),
        # nn.Linear(num_features * embedding_dim, lstm_dim)
        "w_fc": u(ks[4], (H, F * E), F * E),
        "b_fc": u(ks[5], (H,), F * E),
        # nn.Linear(1000 + lstm_dim, num_classes)
        "w_fin": u(ks[6], (C, ENC + H), ENC + H),
        "b_fin": u(ks[7], (C,), ENC + H),
    }


if __name__ == "__main__":
    # max_len=16, embedding_dim=32, lstm_dim=64, num_features=4,
    # num_classes=10, rate=0.5, "batch" (== LSTM seq len here) T=8
    T, F, L, E, H, C, ENC = 8, 4, 16, 32, 64, 10, 1000

    key = jax.random.PRNGKey(0)
    k_enc, k_dec, k_par = jax.random.split(key, 3)
    enc_out = jax.random.normal(k_enc, (T, ENC), jnp.float32)
    dec_inp = jax.random.normal(k_dec, (T, F, L), jnp.float32)
    params = init_params(k_par, L, E, H, F, C, ENC)

    out = rnn_decoder_forward(enc_out, dec_inp, params)
    out = jax.block_until_ready(out)

    ref = reference(enc_out, dec_inp, params)
    assert out.shape == (T, C), out.shape
    assert jnp.allclose(out, ref, atol=1e-4, rtol=1e-4), \
        float(jnp.max(jnp.abs(out - ref)))
    print("KERNEL_OK")
</pallas_src>

<mosaic_0001>
module attributes {stable_mosaic.version = 11 : i64} {
  func.func @rnn_decoder_kernel(%arg0: memref<8x64xf32, #tpu.memory_space<vmem>>, %arg1: memref<64x512xf32, #tpu.memory_space<vmem>>, %arg2: memref<1x512xf32, #tpu.memory_space<vmem>>, %arg3: memref<128x512xf32, #tpu.memory_space<vmem>>, %arg4: memref<128x64xf32, #tpu.memory_space<vmem>>, %arg5: memref<1x64xf32, #tpu.memory_space<vmem>>, %arg6: memref<64x128xf32, #tpu.memory_space<vmem>>, %arg7: memref<8x128xf32, #tpu.memory_space<vmem>>, %arg8: memref<8x128xf32, #tpu.memory_space<vmem>>) attributes {dimension_semantics = [], scalar_prefetch = 0 : i64, scratch_operands = 0 : i64, tpu.core_type = #tpu.core_type<tc>} {
    %c0 = arith.constant 0 : index
    %c0_0 = arith.constant 0 : index
    %0 = vector.load %arg0[%c0, %c0_0] : memref<8x64xf32, #tpu.memory_space<vmem>>, vector<8x64xf32>
    %c0_1 = arith.constant 0 : index
    %c0_2 = arith.constant 0 : index
    %1 = vector.load %arg1[%c0_1, %c0_2] : memref<64x512xf32, #tpu.memory_space<vmem>>, vector<64x512xf32>
    %cst = arith.constant dense<0.000000e+00> : vector<8x512xf32>
    %2 = tpu.matmul %0, %1, %cst {dimension_numbers = #tpu.dot_dimension_numbers<[1], [0], [0], [1], [0, 0, 1, 1], [], []>} : vector<8x64xf32>, vector<64x512xf32>, vector<8x512xf32> -> vector<8x512xf32>
    %c0_3 = arith.constant 0 : index
    %c0_4 = arith.constant 0 : index
    %3 = vector.load %arg2[%c0_3, %c0_4] : memref<1x512xf32, #tpu.memory_space<vmem>>, vector<1x512xf32>
    %4 = vector.broadcast %3 : vector<1x512xf32> to vector<8x512xf32>
    %5 = arith.addf %2, %4 : vector<8x512xf32>
    %c0_5 = arith.constant 0 : index
    %c0_6 = arith.constant 0 : index
    %6 = vector.load %arg3[%c0_5, %c0_6] : memref<128x512xf32, #tpu.memory_space<vmem>>, vector<128x512xf32>
    %cst_7 = arith.constant 0.000000e+00 : f32
    %7 = vector.broadcast %cst_7 : f32 to vector<1x128xf32>
    %cst_8 = arith.constant 0.000000e+00 : f32
    %8 = vector.broadcast %cst_8 : f32 to vector<1x128xf32>
    %9 = vector.extract_strided_slice %5 {offsets = [0, 0], sizes = [1, 512], strides = [1, 1]} : vector<8x512xf32> to vector<1x512xf32>
    %cst_9 = arith.constant dense<0.000000e+00> : vector<1x512xf32>
    %10 = tpu.matmul %7, %6, %cst_9 {dimension_numbers = #tpu.dot_dimension_numbers<[1], [0], [0], [1], [0, 0, 1, 1], [], []>} : vector<1x128xf32>, vector<128x512xf32>, vector<1x512xf32> -> vector<1x512xf32>
    %11 = arith.addf %9, %10 : vector<1x512xf32>
    %12 = math.tanh %11 : vector<1x512xf32>
    %13 = vector.extract_strided_slice %12 {offsets = [0, 0], sizes = [1, 128], strides = [1, 1]} : vector<1x512xf32> to vector<1x128xf32>
    %cst_10 = arith.constant 5.000000e-01 : f32
    %14 = vector.broadcast %cst_10 : f32 to vector<1x128xf32>
    %15 = arith.mulf %14, %13 : vector<1x128xf32>
    %cst_11 = arith.constant 5.000000e-01 : f32
    %16 = vector.broadcast %cst_11 : f32 to vector<1x128xf32>
    %17 = arith.addf %15, %16 : vector<1x128xf32>
    %18 = vector.extract_strided_slice %12 {offsets = [0, 128], sizes = [1, 128], strides = [1, 1]} : vector<1x512xf32> to vector<1x128xf32>
    %cst_12 = arith.constant 5.000000e-01 : f32
    %19 = vector.broadcast %cst_12 : f32 to vector<1x128xf32>
    %20 = arith.mulf %19, %18 : vector<1x128xf32>
    %cst_13 = arith.constant 5.000000e-01 : f32
    %21 = vector.broadcast %cst_13 : f32 to vector<1x128xf32>
    %22 = arith.addf %20, %21 : vector<1x128xf32>
    %23 = vector.extract_strided_slice %12 {offsets = [0, 256], sizes = [1, 128], strides = [1, 1]} : vector<1x512xf32> to vector<1x128xf32>
    %24 = vector.extract_strided_slice %12 {offsets = [0, 384], sizes = [1, 128], strides = [1, 1]} : vector<1x512xf32> to vector<1x128xf32>
    %cst_14 = arith.constant 5.000000e-01 : f32
    %25 = vector.broadcast %cst_14 : f32 to vector<1x128xf32>
    %26 = arith.mulf %25, %24 : vector<1x128xf32>
    %cst_15 = arith.constant 5.000000e-01 : f32
    %27 = vector.broadcast %cst_15 : f32 to vector<1x128xf32>
    %28 = arith.addf %26, %27 : vector<1x128xf32>
    %29 = arith.mulf %22, %8 : vector<1x128xf32>
    %30 = arith.mulf %17, %23 : vector<1x128xf32>
    %31 = arith.addf %29, %30 : vector<1x128xf32>
    %32 = math.tanh %31 : vector<1x128xf32>
    %33 = arith.mulf %28, %32 : vector<1x128xf32>
    %34 = vector.extract_strided_slice %5 {offsets = [1, 0], sizes = [1, 512], strides = [1, 1]} : vector<8x512xf32> to vector<1x512xf32>
    %cst_16 = arith.constant dense<0.000000e+00> : vector<1x512xf32>
    %35 = tpu.matmul %33, %6, %cst_16 {dimension_numbers = #tpu.dot_dimension_numbers<[1], [0], [0], [1], [0, 0, 1, 1], [], []>} : vector<1x128xf32>, vector<128x512xf32>, vector<1x512xf32> -> vector<1x512xf32>
    %36 = arith.addf %34, %35 : vector<1x512xf32>
    %37 = math.tanh %36 : vector<1x512xf32>
    %38 = vector.extract_strided_slice %37 {offsets = [0, 0], sizes = [1, 128], strides = [1, 1]} : vector<1x512xf32> to vector<1x128xf32>
    %cst_17 = arith.constant 5.000000e-01 : f32
    %39 = vector.broadcast %cst_17 : f32 to vector<1x128xf32>
    %40 = arith.mulf %39, %38 : vector<1x128xf32>
    %cst_18 = arith.constant 5.000000e-01 : f32
    %41 = vector.broadcast %cst_18 : f32 to vector<1x128xf32>
    %42 = arith.addf %40, %41 : vector<1x128xf32>
    %43 = vector.extract_strided_slice %37 {offsets = [0, 128], sizes = [1, 128], strides = [1, 1]} : vector<1x512xf32> to vector<1x128xf32>
    %cst_19 = arith.constant 5.000000e-01 : f32
    %44 = vector.broadcast %cst_19 : f32 to vector<1x128xf32>
    %45 = arith.mulf %44, %43 : vector<1x128xf32>
    %cst_20 = arith.constant 5.000000e-01 : f32
    %46 = vector.broadcast %cst_20 : f32 to vector<1x128xf32>
    %47 = arith.addf %45, %46 : vector<1x128xf32>
    %48 = vector.extract_strided_slice %37 {offsets = [0, 256], sizes = [1, 128], strides = [1, 1]} : vector<1x512xf32> to vector<1x128xf32>
    %49 = vector.extract_strided_slice %37 {offsets = [0, 384], sizes = [1, 128], strides = [1, 1]} : vector<1x512xf32> to vector<1x128xf32>
    %cst_21 = arith.constant 5.000000e-01 : f32
    %50 = vector.broadcast %cst_21 : f32 to vector<1x128xf32>
    %51 = arith.mulf %50, %49 : vector<1x128xf32>
    %cst_22 = arith.constant 5.000000e-01 : f32
    %52 = vector.broadcast %cst_22 : f32 to vector<1x128xf32>
    %53 = arith.addf %51, %52 : vector<1x128xf32>
    %54 = arith.mulf %47, %31 : vector<1x128xf32>
    %55 = arith.mulf %42, %48 : vector<1x128xf32>
    %56 = arith.addf %54, %55 : vector<1x128xf32>
    %57 = math.tanh %56 : vector<1x128xf32>
    %58 = arith.mulf %53, %57 : vector<1x128xf32>
    %59 = vector.extract_strided_slice %5 {offsets = [2, 0], sizes = [1, 512], strides = [1, 1]} : vector<8x512xf32> to vector<1x512xf32>
    %cst_23 = arith.constant dense<0.000000e+00> : vector<1x512xf32>
    %60 = tpu.matmul %58, %6, %cst_23 {dimension_numbers = #tpu.dot_dimension_numbers<[1], [0], [0], [1], [0, 0, 1, 1], [], []>} : vector<1x128xf32>, vector<128x512xf32>, vector<1x512xf32> -> vector<1x512xf32>
    %61 = arith.addf %59, %60 : vector<1x512xf32>
    %62 = math.tanh %61 : vector<1x512xf32>
    %63 = vector.extract_strided_slice %62 {offsets = [0, 0], sizes = [1, 128], strides = [1, 1]} : vector<1x512xf32> to vector<1x128xf32>
    %cst_24 = arith.constant 5.000000e-01 : f32
    %64 = vector.broadcast %cst_24 : f32 to vector<1x128xf32>
    %65 = arith.mulf %64, %63 : vector<1x128xf32>
    %cst_25 = arith.constant 5.000000e-01 : f32
    %66 = vector.broadcast %cst_25 : f32 to vector<1x128xf32>
    %67 = arith.addf %65, %66 : vector<1x128xf32>
    %68 = vector.extract_strided_slice %62 {offsets = [0, 128], sizes = [1, 128], strides = [1, 1]} : vector<1x512xf32> to vector<1x128xf32>
    %cst_26 = arith.constant 5.000000e-01 : f32
    %69 = vector.broadcast %cst_26 : f32 to vector<1x128xf32>
    %70 = arith.mulf %69, %68 : vector<1x128xf32>
    %cst_27 = arith.constant 5.000000e-01 : f32
    %71 = vector.broadcast %cst_27 : f32 to vector<1x128xf32>
    %72 = arith.addf %70, %71 : vector<1x128xf32>
    %73 = vector.extract_strided_slice %62 {offsets = [0, 256], sizes = [1, 128], strides = [1, 1]} : vector<1x512xf32> to vector<1x128xf32>
    %74 = vector.extract_strided_slice %62 {offsets = [0, 384], sizes = [1, 128], strides = [1, 1]} : vector<1x512xf32> to vector<1x128xf32>
    %cst_28 = arith.constant 5.000000e-01 : f32
    %75 = vector.broadcast %cst_28 : f32 to vector<1x128xf32>
    %76 = arith.mulf %75, %74 : vector<1x128xf32>
    %cst_29 = arith.constant 5.000000e-01 : f32
    %77 = vector.broadcast %cst_29 : f32 to vector<1x128xf32>
    %78 = arith.addf %76, %77 : vector<1x128xf32>
    %79 = arith.mulf %72, %56 : vector<1x128xf32>
    %80 = arith.mulf %67, %73 : vector<1x128xf32>
    %81 = arith.addf %79, %80 : vector<1x128xf32>
    %82 = math.tanh %81 : vector<1x128xf32>
    %83 = arith.mulf %78, %82 : vector<1x128xf32>
    %84 = vector.extract_strided_slice %5 {offsets = [3, 0], sizes = [1, 512], strides = [1, 1]} : vector<8x512xf32> to vector<1x512xf32>
    %cst_30 = arith.constant dense<0.000000e+00> : vector<1x512xf32>
    %85 = tpu.matmul %83, %6, %cst_30 {dimension_numbers = #tpu.dot_dimension_numbers<[1], [0], [0], [1], [0, 0, 1, 1], [], []>} : vector<1x128xf32>, vector<128x512xf32>, vector<1x512xf32> -> vector<1x512xf32>
    %86 = arith.addf %84, %85 : vector<1x512xf32>
    %87 = math.tanh %86 : vector<1x512xf32>
    %88 = vector.extract_strided_slice %87 {offsets = [0, 0], sizes = [1, 128], strides = [1, 1]} : vector<1x512xf32> to vector<1x128xf32>
    %cst_31 = arith.constant 5.000000e-01 : f32
    %89 = vector.broadcast %cst_31 : f32 to vector<1x128xf32>
    %90 = arith.mulf %89, %88 : vector<1x128xf32>
    %cst_32 = arith.constant 5.000000e-01 : f32
    %91 = vector.broadcast %cst_32 : f32 to vector<1x128xf32>
    %92 = arith.addf %90, %91 : vector<1x128xf32>
    %93 = vector.extract_strided_slice %87 {offsets = [0, 128], sizes = [1, 128], strides = [1, 1]} : vector<1x512xf32> to vector<1x128xf32>
    %cst_33 = arith.constant 5.000000e-01 : f32
    %94 = vector.broadcast %cst_33 : f32 to vector<1x128xf32>
    %95 = arith.mulf %94, %93 : vector<1x128xf32>
    %cst_34 = arith.constant 5.000000e-01 : f32
    %96 = vector.broadcast %cst_34 : f32 to vector<1x128xf32>
    %97 = arith.addf %95, %96 : vector<1x128xf32>
    %98 = vector.extract_strided_slice %87 {offsets = [0, 256], sizes = [1, 128], strides = [1, 1]} : vector<1x512xf32> to vector<1x128xf32>
    %99 = vector.extract_strided_slice %87 {offsets = [0, 384], sizes = [1, 128], strides = [1, 1]} : vector<1x512xf32> to vector<1x128xf32>
    %cst_35 = arith.constant 5.000000e-01 : f32
    %100 = vector.broadcast %cst_35 : f32 to vector<1x128xf32>
    %101 = arith.mulf %100, %99 : vector<1x128xf32>
    %cst_36 = arith.constant 5.000000e-01 : f32
    %102 = vector.broadcast %cst_36 : f32 to vector<1x128xf32>
    %103 = arith.addf %101, %102 : vector<1x128xf32>
    %104 = arith.mulf %97, %81 : vector<1x128xf32>
    %105 = arith.mulf %92, %98 : vector<1x128xf32>
    %106 = arith.addf %104, %105 : vector<1x128xf32>
    %107 = math.tanh %106 : vector<1x128xf32>
    %108 = arith.mulf %103, %107 : vector<1x128xf32>
    %109 = vector.extract_strided_slice %5 {offsets = [4, 0], sizes = [1, 512], strides = [1, 1]} : vector<8x512xf32> to vector<1x512xf32>
    %cst_37 = arith.constant dense<0.000000e+00> : vector<1x512xf32>
    %110 = tpu.matmul %108, %6, %cst_37 {dimension_numbers = #tpu.dot_dimension_numbers<[1], [0], [0], [1], [0, 0, 1, 1], [], []>} : vector<1x128xf32>, vector<128x512xf32>, vector<1x512xf32> -> vector<1x512xf32>
    %111 = arith.addf %109, %110 : vector<1x512xf32>
    %112 = math.tanh %111 : vector<1x512xf32>
    %113 = vector.extract_strided_slice %112 {offsets = [0, 0], sizes = [1, 128], strides = [1, 1]} : vector<1x512xf32> to vector<1x128xf32>
    %cst_38 = arith.constant 5.000000e-01 : f32
    %114 = vector.broadcast %cst_38 : f32 to vector<1x128xf32>
    %115 = arith.mulf %114, %113 : vector<1x128xf32>
    %cst_39 = arith.constant 5.000000e-01 : f32
    %116 = vector.broadcast %cst_39 : f32 to vector<1x128xf32>
    %117 = arith.addf %115, %116 : vector<1x128xf32>
    %118 = vector.extract_strided_slice %112 {offsets = [0, 128], sizes = [1, 128], strides = [1, 1]} : vector<1x512xf32> to vector<1x128xf32>
    %cst_40 = arith.constant 5.000000e-01 : f32
    %119 = vector.broadcast %cst_40 : f32 to vector<1x128xf32>
    %120 = arith.mulf %119, %118 : vector<1x128xf32>
    %cst_41 = arith.constant 5.000000e-01 : f32
    %121 = vector.broadcast %cst_41 : f32 to vector<1x128xf32>
    %122 = arith.addf %120, %121 : vector<1x128xf32>
    %123 = vector.extract_strided_slice %112 {offsets = [0, 256], sizes = [1, 128], strides = [1, 1]} : vector<1x512xf32> to vector<1x128xf32>
    %124 = vector.extract_strided_slice %112 {offsets = [0, 384], sizes = [1, 128], strides = [1, 1]} : vector<1x512xf32> to vector<1x128xf32>
    %cst_42 = arith.constant 5.000000e-01 : f32
    %125 = vector.broadcast %cst_42 : f32 to vector<1x128xf32>
    %126 = arith.mulf %125, %124 : vector<1x128xf32>
    %cst_43 = arith.constant 5.000000e-01 : f32
    %127 = vector.broadcast %cst_43 : f32 to vector<1x128xf32>
    %128 = arith.addf %126, %127 : vector<1x128xf32>
    %129 = arith.mulf %122, %106 : vector<1x128xf32>
    %130 = arith.mulf %117, %123 : vector<1x128xf32>
    %131 = arith.addf %129, %130 : vector<1x128xf32>
    %132 = math.tanh %131 : vector<1x128xf32>
    %133 = arith.mulf %128, %132 : vector<1x128xf32>
    %134 = vector.extract_strided_slice %5 {offsets = [5, 0], sizes = [1, 512], strides = [1, 1]} : vector<8x512xf32> to vector<1x512xf32>
    %cst_44 = arith.constant dense<0.000000e+00> : vector<1x512xf32>
    %135 = tpu.matmul %133, %6, %cst_44 {dimension_numbers = #tpu.dot_dimension_numbers<[1], [0], [0], [1], [0, 0, 1, 1], [], []>} : vector<1x128xf32>, vector<128x512xf32>, vector<1x512xf32> -> vector<1x512xf32>
    %136 = arith.addf %134, %135 : vector<1x512xf32>
    %137 = math.tanh %136 : vector<1x512xf32>
    %138 = vector.extract_strided_slice %137 {offsets = [0, 0], sizes = [1, 128], strides = [1, 1]} : vector<1x512xf32> to vector<1x128xf32>
    %cst_45 = arith.constant 5.000000e-01 : f32
    %139 = vector.broadcast %cst_45 : f32 to vector<1x128xf32>
    %140 = arith.mulf %139, %138 : vector<1x128xf32>
    %cst_46 = arith.constant 5.000000e-01 : f32
    %141 = vector.broadcast %cst_46 : f32 to vector<1x128xf32>
    %142 = arith.addf %140, %141 : vector<1x128xf32>
    %143 = vector.extract_strided_slice %137 {offsets = [0, 128], sizes = [1, 128], strides = [1, 1]} : vector<1x512xf32> to vector<1x128xf32>
    %cst_47 = arith.constant 5.000000e-01 : f32
    %144 = vector.broadcast %cst_47 : f32 to vector<1x128xf32>
    %145 = arith.mulf %144, %143 : vector<1x128xf32>
    %cst_48 = arith.constant 5.000000e-01 : f32
    %146 = vector.broadcast %cst_48 : f32 to vector<1x128xf32>
    %147 = arith.addf %145, %146 : vector<1x128xf32>
    %148 = vector.extract_strided_slice %137 {offsets = [0, 256], sizes = [1, 128], strides = [1, 1]} : vector<1x512xf32> to vector<1x128xf32>
    %149 = vector.extract_strided_slice %137 {offsets = [0, 384], sizes = [1, 128], strides = [1, 1]} : vector<1x512xf32> to vector<1x128xf32>
    %cst_49 = arith.constant 5.000000e-01 : f32
    %150 = vector.broadcast %cst_49 : f32 to vector<1x128xf32>
    %151 = arith.mulf %150, %149 : vector<1x128xf32>
    %cst_50 = arith.constant 5.000000e-01 : f32
    %152 = vector.broadcast %cst_50 : f32 to vector<1x128xf32>
    %153 = arith.addf %151, %152 : vector<1x128xf32>
    %154 = arith.mulf %147, %131 : vector<1x128xf32>
    %155 = arith.mulf %142, %148 : vector<1x128xf32>
    %156 = arith.addf %154, %155 : vector<1x128xf32>
    %157 = math.tanh %156 : vector<1x128xf32>
    %158 = arith.mulf %153, %157 : vector<1x128xf32>
    %159 = vector.extract_strided_slice %5 {offsets = [6, 0], sizes = [1, 512], strides = [1, 1]} : vector<8x512xf32> to vector<1x512xf32>
    %cst_51 = arith.constant dense<0.000000e+00> : vector<1x512xf32>
    %160 = tpu.matmul %158, %6, %cst_51 {dimension_numbers = #tpu.dot_dimension_numbers<[1], [0], [0], [1], [0, 0, 1, 1], [], []>} : vector<1x128xf32>, vector<128x512xf32>, vector<1x512xf32> -> vector<1x512xf32>
    %161 = arith.addf %159, %160 : vector<1x512xf32>
    %162 = math.tanh %161 : vector<1x512xf32>
    %163 = vector.extract_strided_slice %162 {offsets = [0, 0], sizes = [1, 128], strides = [1, 1]} : vector<1x512xf32> to vector<1x128xf32>
    %cst_52 = arith.constant 5.000000e-01 : f32
    %164 = vector.broadcast %cst_52 : f32 to vector<1x128xf32>
    %165 = arith.mulf %164, %163 : vector<1x128xf32>
    %cst_53 = arith.constant 5.000000e-01 : f32
    %166 = vector.broadcast %cst_53 : f32 to vector<1x128xf32>
    %167 = arith.addf %165, %166 : vector<1x128xf32>
    %168 = vector.extract_strided_slice %162 {offsets = [0, 128], sizes = [1, 128], strides = [1, 1]} : vector<1x512xf32> to vector<1x128xf32>
    %cst_54 = arith.constant 5.000000e-01 : f32
    %169 = vector.broadcast %cst_54 : f32 to vector<1x128xf32>
    %170 = arith.mulf %169, %168 : vector<1x128xf32>
    %cst_55 = arith.constant 5.000000e-01 : f32
    %171 = vector.broadcast %cst_55 : f32 to vector<1x128xf32>
    %172 = arith.addf %170, %171 : vector<1x128xf32>
    %173 = vector.extract_strided_slice %162 {offsets = [0, 256], sizes = [1, 128], strides = [1, 1]} : vector<1x512xf32> to vector<1x128xf32>
    %174 = vector.extract_strided_slice %162 {offsets = [0, 384], sizes = [1, 128], strides = [1, 1]} : vector<1x512xf32> to vector<1x128xf32>
    %cst_56 = arith.constant 5.000000e-01 : f32
    %175 = vector.broadcast %cst_56 : f32 to vector<1x128xf32>
    %176 = arith.mulf %175, %174 : vector<1x128xf32>
    %cst_57 = arith.constant 5.000000e-01 : f32
    %177 = vector.broadcast %cst_57 : f32 to vector<1x128xf32>
    %178 = arith.addf %176, %177 : vector<1x128xf32>
    %179 = arith.mulf %172, %156 : vector<1x128xf32>
    %180 = arith.mulf %167, %173 : vector<1x128xf32>
    %181 = arith.addf %179, %180 : vector<1x128xf32>
    %182 = math.tanh %181 : vector<1x128xf32>
    %183 = arith.mulf %178, %182 : vector<1x128xf32>
    %184 = vector.extract_strided_slice %5 {offsets = [7, 0], sizes = [1, 512], strides = [1, 1]} : vector<8x512xf32> to vector<1x512xf32>
    %cst_58 = arith.constant dense<0.000000e+00> : vector<1x512xf32>
    %185 = tpu.matmul %183, %6, %cst_58 {dimension_numbers = #tpu.dot_dimension_numbers<[1], [0], [0], [1], [0, 0, 1, 1], [], []>} : vector<1x128xf32>, vector<128x512xf32>, vector<1x512xf32> -> vector<1x512xf32>
    %186 = arith.addf %184, %185 : vector<1x512xf32>
    %187 = math.tanh %186 : vector<1x512xf32>
    %188 = vector.extract_strided_slice %187 {offsets = [0, 0], sizes = [1, 128], strides = [1, 1]} : vector<1x512xf32> to vector<1x128xf32>
    %cst_59 = arith.constant 5.000000e-01 : f32
    %189 = vector.broadcast %cst_59 : f32 to vector<1x128xf32>
    %190 = arith.mulf %189, %188 : vector<1x128xf32>
    %cst_60 = arith.constant 5.000000e-01 : f32
    %191 = vector.broadcast %cst_60 : f32 to vector<1x128xf32>
    %192 = arith.addf %190, %191 : vector<1x128xf32>
    %193 = vector.extract_strided_slice %187 {offsets = [0, 128], sizes = [1, 128], strides = [1, 1]} : vector<1x512xf32> to vector<1x128xf32>
    %cst_61 = arith.constant 5.000000e-01 : f32
    %194 = vector.broadcast %cst_61 : f32 to vector<1x128xf32>
    %195 = arith.mulf %194, %193 : vector<1x128xf32>
    %cst_62 = arith.constant 5.000000e-01 : f32
    %196 = vector.broadcast %cst_62 : f32 to vector<1x128xf32>
    %197 = arith.addf %195, %196 : vector<1x128xf32>
    %198 = vector.extract_strided_slice %187 {offsets = [0, 256], sizes = [1, 128], strides = [1, 1]} : vector<1x512xf32> to vector<1x128xf32>
    %199 = vector.extract_strided_slice %187 {offsets = [0, 384], sizes = [1, 128], strides = [1, 1]} : vector<1x512xf32> to vector<1x128xf32>
    %cst_63 = arith.constant 5.000000e-01 : f32
    %200 = vector.broadcast %cst_63 : f32 to vector<1x128xf32>
    %201 = arith.mulf %200, %199 : vector<1x128xf32>
    %cst_64 = arith.constant 5.000000e-01 : f32
    %202 = vector.broadcast %cst_64 : f32 to vector<1x128xf32>
    %203 = arith.addf %201, %202 : vector<1x128xf32>
    %204 = arith.mulf %197, %181 : vector<1x128xf32>
    %205 = arith.mulf %192, %198 : vector<1x128xf32>
    %206 = arith.addf %204, %205 : vector<1x128xf32>
    %207 = math.tanh %206 : vector<1x128xf32>
    %208 = arith.mulf %203, %207 : vector<1x128xf32>
    %209 = tpu.concatenate %33, %58, %83, %108, %133, %158, %183, %208 in 0 : vector<1x128xf32>, vector<1x128xf32>, vector<1x128xf32>, vector<1x128xf32>, vector<1x128xf32>, vector<1x128xf32>, vector<1x128xf32>, vector<1x128xf32> -> vector<8x128xf32>
    %c0_65 = arith.constant 0 : index
    %c0_66 = arith.constant 0 : index
    %210 = vector.load %arg4[%c0_65, %c0_66] : memref<128x64xf32, #tpu.memory_space<vmem>>, vector<128x64xf32>
    %cst_67 = arith.constant dense<0.000000e+00> : vector<8x64xf32>
    %211 = tpu.matmul %209, %210, %cst_67 {dimension_numbers = #tpu.dot_dimension_numbers<[1], [0], [0], [1], [0, 0, 1, 1], [], []>} : vector<8x128xf32>, vector<128x64xf32>, vector<8x64xf32> -> vector<8x64xf32>
    %c0_68 = arith.constant 0 : index
    %c0_69 = arith.constant 0 : index
    %212 = vector.load %arg5[%c0_68, %c0_69] : memref<1x64xf32, #tpu.memory_space<vmem>>, vector<1x64xf32>
    %213 = vector.broadcast %212 : vector<1x64xf32> to vector<8x64xf32>
    %214 = arith.addf %211, %213 : vector<8x64xf32>
    %c0_70 = arith.constant 0 : index
    %c0_71 = arith.constant 0 : index
    %215 = vector.load %arg7[%c0_70, %c0_71] : memref<8x128xf32, #tpu.memory_space<vmem>>, vector<8x128xf32>
    %c0_72 = arith.constant 0 : index
    %c0_73 = arith.constant 0 : index
    %216 = vector.load %arg6[%c0_72, %c0_73] : memref<64x128xf32, #tpu.memory_space<vmem>>, vector<64x128xf32>
    %cst_74 = arith.constant dense<0.000000e+00> : vector<8x128xf32>
    %217 = tpu.matmul %214, %216, %cst_74 {dimension_numbers = #tpu.dot_dimension_numbers<[1], [0], [0], [1], [0, 0, 1, 1], [], []>} : vector<8x64xf32>, vector<64x128xf32>, vector<8x128xf32> -> vector<8x128xf32>
    %218 = arith.addf %215, %217 : vector<8x128xf32>
    %c0_75 = arith.constant 0 : index
    %c0_76 = arith.constant 0 : index
    %219 = vector.load %arg8[%c0_75, %c0_76] : memref<8x128xf32, #tpu.memory_space<vmem>>, vector<8x128xf32>
    tpu.vector_store %arg8[%c0_75, %c0_76], %218 {strides = array<i32>} : memref<8x128xf32, #tpu.memory_space<vmem>>, vector<8x128xf32>,
    return
  }
}

</mosaic_0001>

<bundles_post_ra>
// kernel: tpu_custom_call.1
= control target key start
LH: loop header
LB: loop body
LE: loop exit
PB: predicated region body
PF: predicated region fallthrough
CT: control target
= control target key end

     0   :  { %13 = vsyncpa [#allocation3], 0  ;;  %s3375_s0 = inlined_call_operand.vmem [shape: f32[8,64], index: 0, kind: input, shape index: {}]   ;;  %s3376_s1 = inlined_call_operand.hbm [shape: f32[64,512], index: 1, kind: input, shape index: {}]   ;;  %s3377_s2 = inlined_call_operand.vmem [shape: f32[1,512], index: 2, kind: input, shape index: {}]   ;;  %s3378_s3 = inlined_call_operand.hbm [shape: f32[128,512], index: 3, kind: input, shape index: {}]   ;;  %s3379_s4 = inlined_call_operand.vmem [shape: f32[128,64], index: 4, kind: input, shape index: {}]   ;;  %s3380_s5 = inlined_call_operand.vmem [shape: f32[1,64], index: 5, kind: input, shape index: {}]   ;;  %s3381_s6 = inlined_call_operand.vmem [shape: f32[64,128], index: 6, kind: input, shape index: {}]   ;;  %s3382_s7 = inlined_call_operand.vmem [shape: f32[8,128], index: 7, kind: input, shape index: {}]   ;;  %s3383_s8 = inlined_call_operand.hbm [shape: f32[8,128], index: 8, kind: output, shape index: {}]  }
   0x1   :  { %14 = vsyncpa [#allocation6], 0 }
   0x2   :  { %15 = vsyncpa [#allocation4], 0  ;;  %s2765_s27 = smov [#allocation2]   ;;  %s2693_s9 = scalar_lea.hbm %s3376_s1, 4096 }
   0x3   :  { %s23_s28 = sshll.u32 %s2765_s27, 4  ;;  %p2694_p0 = scmp.ne.s32.totalorder %s3376_s1, %s2693_s9  ;;  %s24_s28 = int_to_ptr.vmem [resolvable:$true] %s23_s28 }
   0x4   :  { %p2697_p1 = scmp.lt.u32.totalorder %s2693_s9, %s3376_s1 }
   0x6   :  { %p2699_p2 = pnand %p2697_p1, %p2694_p0 }
   0x8   :  { %2702 = shalt.err (!%p2699_p2)
}
   0x9   :  { %s2703_s14 = scalar_lea.vmem %s24_s28, 4096  ;;  %p2708_p4 = scmp.lt.s32.totalorder %s24_s28, %s24_s28 }
   0xa   :  { %p2704_p3 = scmp.ne.s32.totalorder %s24_s28, %s2703_s14  ;;  %p2709_p5 = scmp.lt.s32.totalorder %s2703_s14, %s2703_s14 }
   0xc   :  { %p2710_p6 = por %p2709_p5, %p2708_p4 }
   0xe   :  { %p2711_p7 = pnand %p2710_p6, %p2704_p3 }
  0x10   :  { %2714 = shalt.err (!%p2711_p7)
}
  0x11   :  { %s2766_s15 = smov 512   ;;  %s2767_s16 = smov 32  }
  0x12   :  { %29 = dma.hbm_to_vmem [thread:$0]  %s3376_s1, 4096, %s24_s28, [#allocation3], %s2766_s15, %s2766_s15, %s2767_s16  }
  0x13   :  { %s2768_s19 = smov [#allocation5]   ;;  %s2715_s23 = scalar_lea.hbm %s3378_s3, 8192 }
  0x14   :  { %s37_s20 = sshll.u32 %s2768_s19, 4  ;;  %p2716_p8 = scmp.ne.s32.totalorder %s3378_s3, %s2715_s23  ;;  %s38_s20 = int_to_ptr.vmem [resolvable:$true] %s37_s20 }
  0x15   :  { %p2719_p9 = scmp.lt.u32.totalorder %s2715_s23, %s3378_s3 }
  0x17   :  { %p2721_p10 = pnand %p2719_p9, %p2716_p8 }
  0x19   :  { %2724 = shalt.err (!%p2721_p10)
}
  0x1a   :  { %s2725_s29 = scalar_lea.vmem %s38_s20, 8192  ;;  %p2730_p12 = scmp.lt.s32.totalorder %s38_s20, %s38_s20 }
  0x1b   :  { %p2726_p11 = scmp.ne.s32.totalorder %s38_s20, %s2725_s29  ;;  %p2731_p13 = scmp.lt.s32.totalorder %s2725_s29, %s2725_s29 }
  0x1d   :  { %p2732_p0 = por %p2731_p13, %p2730_p12 }
  0x1f   :  { %p2733_p1 = pnand %p2732_p0, %p2726_p11 }
  0x21   :  { %2736 = shalt.err (!%p2733_p1)
}
  0x22   :  { %43 = dma.hbm_to_vmem [thread:$0]  %s3378_s3, 8192, %s38_s20, [#allocation6], %s2766_s15, %s2766_s15, %s2767_s16  }
  0x23   :  { %2759 = dma.done.wait [#allocation3], 4096  }
  0x24   :  { %2760 = vsyncadd [#allocation3], 4294963200 }
  0x25   :  { %2761 = dma.done.wait [#allocation6], 8192  }
  0x26   :  { %2762 = vsyncadd [#allocation6], 4294959104  ;;  %v2769_v0 = vmov 0.0   ;;  %v60_v1 = vld [vmem:[#allocation2 + $0x8] sm:$0xff]  ;;  %v62_v3 = vld [vmem:[#allocation2 + $0x18] sm:$0xff]  ;;  %vm113_vm0 = vcmask 523264  }
  0x27   :  { %181 = vmatprep.mubr.f32.mxu0 %v2769_v0  ;;  %252 = vmatprep.mubr.f32.mxu1 %v2769_v0  ;;  %v64_v2 = vld [vmem:[#allocation2 + $0x28] sm:$0xff]  ;;  %v66_v5 = vld [vmem:[#allocation2 + $0x38] sm:$0xff]  ;;  %v59_v6 = vld [vmem:[#allocation2] sm:$0xff]  ;;  %vm1734_vm1 = vcmask 1040384   ;;  %vm1736_vm2 = vcmask 1041408   ;;  %vm1738_vm3 = vcmask 1042432  }
  0x28   :  { %v2025_v4 = vpack.c.bf16 %v64_v2, %v60_v1  ;;  %v63_v7 = vld [vmem:[#allocation2 + $0x20] sm:$0xff]  ;;  %v2041_v8 = vpack.c.bf16 %v66_v5, %v62_v3  ;;  %v61_v10 = vld [vmem:[#allocation2 + $0x10] sm:$0xff]  ;;  %v68_v12 = vld [vmem:[#allocation2 + $0x48] sm:$0xff]  ;;  %vm1740_vm4 = vcmask 1043456   ;;  %vm1742_vm5 = vcmask 1044480   ;;  %s2772_s9 = smov [#allocation7]  }
  0x29   :  { %v2027_v9 = vpack.c.bf16 %v63_v7, %v59_v6  ;;  %v65_v11 = vld [vmem:[#allocation2 + $0x30] sm:$0xff]  ;;  %v72_v14 = vld [vmem:[#allocation2 + $0x68] sm:$0xff]  ;;  %v70_v15 = vld [vmem:[#allocation2 + $0x58] sm:$0xff]  ;;  %vm1744_vm6 = vcmask 1045504   ;;  %vm2771_vm7 = vmmov 0   ;;  %vm1746_vm8 = vcmask 1046528  }
  0x2a   :  { %2026 = vmatprep.subr.bf16.mxu0 %v2025_v4  ;;  %v2043_v13 = vpack.c.bf16 %v65_v11, %v61_v10  ;;  %v74_v16 = vld [vmem:[#allocation2 + $0x78] sm:$0xff]  ;;  %2042 = vmatprep.subr.bf16.mxu1 %v2041_v8  ;;  %v2029_v17 = vpack.c.bf16 %v72_v14, %v68_v12  ;;  %v67_v19 = vld [vmem:[#allocation2 + $0x40] sm:$0xff]  ;;  %v69_v21 = vld [vmem:[#allocation2 + $0x50] sm:$0xff] }
  0x2b   :  { %2028 = vmatpush1.bf16.msra.mxu0 %v2027_v9  ;;  %v2045_v18 = vpack.c.bf16 %v74_v16, %v70_v15  ;;  %v71_v20 = vld [vmem:[#allocation2 + $0x60] sm:$0xff]  ;;  %v73_v23 = vld [vmem:[#allocation2 + $0x70] sm:$0xff]  ;;  %v76_v24 = vld [vmem:[#allocation2 + $0x88] sm:$0xff] }
  0x2c   :  { %2044 = vmatpush1.bf16.msra.mxu1 %v2043_v13  ;;  %v2031_v22 = vpack.c.bf16 %v71_v20, %v67_v19  ;;  %v80_v25 = vld [vmem:[#allocation2 + $0xa8] sm:$0xff]  ;;  %2030 = vmatprep.subr.bf16.mxu0 %v2029_v17  ;;  %v2047_v26 = vpack.c.bf16 %v73_v23, %v69_v21  ;;  %v78_v28 = vld [vmem:[#allocation2 + $0x98] sm:$0xff]  ;;  %v75_v30 = vld [vmem:[#allocation2 + $0x80] sm:$0xff] }
  0x2d   :  { %2046 = vmatprep.subr.bf16.mxu1 %v2045_v18  ;;  %v2033_v27 = vpack.c.bf16 %v80_v25, %v76_v24  ;;  %v82_v29 = vld [vmem:[#allocation2 + $0xb8] sm:$0xff]  ;;  %v79_v32 = vld [vmem:[#allocation2 + $0xa0] sm:$0xff]  ;;  %v77_v33 = vld [vmem:[#allocation2 + $0x90] sm:$0xff] }
  0x2e   :  { %v2049_v31 = vpack.c.bf16 %v82_v29, %v78_v28  ;;  %v81_v34 = vld [vmem:[#allocation2 + $0xb0] sm:$0xff]  ;;  %v2035_v35 = vpack.c.bf16 %v79_v32, %v75_v30  ;;  %v84_v36 = vld [vmem:[#allocation2 + $0xc8] sm:$0xff]  ;;  %v86_v38 = vld [vmem:[#allocation2 + $0xd8] sm:$0xff] }
  0x2f   :  { %2032 = vmatpush1.bf16.msra.mxu0 %v2031_v22  ;;  %v88_v37 = vld [vmem:[#allocation2 + $0xe8] sm:$0xff]  ;;  %v2051_v39 = vpack.c.bf16 %v81_v34, %v77_v33  ;;  %v90_v41 = vld [vmem:[#allocation2 + $0xf8] sm:$0xff]  ;;  %v83_v42 = vld [vmem:[#allocation2 + $0xc0] sm:$0xff] }
  0x30   :  { %2048 = vmatpush1.bf16.msra.mxu1 %v2047_v26  ;;  %2034 = vmatprep.subr.bf16.mxu0 %v2033_v27  ;;  %v2037_v40 = vpack.c.bf16 %v88_v37, %v84_v36  ;;  %v87_v43 = vld [vmem:[#allocation2 + $0xe0] sm:$0xff]  ;;  %v2053_v44 = vpack.c.bf16 %v90_v41, %v86_v38  ;;  %v85_v45 = vld [vmem:[#allocation2 + $0xd0] sm:$0xff]  ;;  %v260_v47 = vld [vmem:[#allocation5 + $0x8] sm:$0xff] }
  0x31   :  { %2050 = vmatprep.subr.bf16.mxu1 %v2049_v31  ;;  %v89_v46 = vld [vmem:[#allocation2 + $0xf0] sm:$0xff]  ;;  %v264_v48 = vld [vmem:[#allocation5 + $0x28] sm:$0xff]  ;;  %v262_v49 = vld [vmem:[#allocation5 + $0x18] sm:$0xff]  ;;  %v2039_v50 = vpack.c.bf16 %v87_v43, %v83_v42 }
  0x32   :  { %v266_v51 = vld [vmem:[#allocation5 + $0x38] sm:$0xff]  ;;  %v2055_v52 = vpack.c.bf16 %v89_v46, %v85_v45  ;;  %v2844_v53 = vpack.c.bf16 %v264_v48, %v260_v47  ;;  %v259_v54 = vld [vmem:[#allocation5] sm:$0xff]  ;;  %v261_v56 = vld [vmem:[#allocation5 + $0x10] sm:$0xff] }
  0x33   :  { %2036 = vmatpush1.bf16.msra.mxu0 %v2035_v35  ;;  %v263_v55 = vld [vmem:[#allocation5 + $0x20] sm:$0xff]  ;;  %v2846_v57 = vpack.c.bf16 %v266_v51, %v262_v49  ;;  %v265_v58 = vld [vmem:[#allocation5 + $0x30] sm:$0xff]  ;;  %v268_v59 = vld [vmem:[#allocation5 + $0x48] sm:$0xff] }
  0x34   :  { %2052 = vmatpush1.bf16.msra.mxu1 %v2051_v39  ;;  %2038 = vmatprep.subr.bf16.mxu0 %v2037_v40  ;;  %v272_v60 = vld [vmem:[#allocation5 + $0x68] sm:$0xff]  ;;  %v270_v61 = vld [vmem:[#allocation5 + $0x58] sm:$0xff]  ;;  %v58_v63 = vld [vmem:[%s3375_s0] sm:$0xff]  ;;  %v2851_v1 = vpack.c.bf16 %v263_v55, %v259_v54  ;;  %v2854_v2 = vpack.c.bf16 %v265_v58, %v261_v56 }
  0x35   :  { %2054 = vmatprep.subr.bf16.mxu1 %v2053_v44  ;;  %v274_v62 = vld [vmem:[#allocation5 + $0x78] sm:$0xff]  ;;  %v2856_v3 = vpack.c.bf16 %v272_v60, %v268_v59  ;;  %v267_v4 = vld [vmem:[#allocation5 + $0x40] sm:$0xff]  ;;  %v269_v6 = vld [vmem:[#allocation5 + $0x50] sm:$0xff] }
  0x36   :  { %v271_v5 = vld [vmem:[#allocation5 + $0x60] sm:$0xff]  ;;  %v2859_v7 = vpack.c.bf16 %v274_v62, %v270_v61  ;;  %v273_v8 = vld [vmem:[#allocation5 + $0x70] sm:$0xff]  ;;  %v276_v9 = vld [vmem:[#allocation5 + $0x88] sm:$0xff] }
  0x37   :  { %2040 = vmatpush1.bf16.msra.mxu0 %v2039_v50  ;;  %v280_v10 = vld [vmem:[#allocation5 + $0xa8] sm:$0xff]  ;;  %v278_v11 = vld [vmem:[#allocation5 + $0x98] sm:$0xff]  ;;  %v2864_v13 = vpack.c.bf16 %v271_v5, %v267_v4  ;;  %v2868_v14 = vpack.c.bf16 %v273_v8, %v269_v6  ;;  %v275_v16 = vld [vmem:[#allocation5 + $0x80] sm:$0xff] }
  0x38   :  { %2056 = vmatpush1.bf16.msra.mxu1 %v2055_v52  ;;  %2058 = vmatprep.subr.bf16.mxu0 %v2844_v53  ;;  %v282_v12 = vld [vmem:[#allocation5 + $0xb8] sm:$0xff]  ;;  %v2870_v15 = vpack.c.bf16 %v280_v10, %v276_v9  ;;  %v279_v17 = vld [vmem:[#allocation5 + $0xa0] sm:$0xff]  ;;  %v277_v18 = vld [vmem:[#allocation5 + $0x90] sm:$0xff] }
  0x39   :  { %2090 = vmatprep.subr.bf16.mxu1 %v2846_v57  ;;  %v2873_v19 = vpack.c.bf16 %v282_v12, %v278_v11  ;;  %v281_v20 = vld [vmem:[#allocation5 + $0xb0] sm:$0xff]  ;;  %v284_v21 = vld [vmem:[#allocation5 + $0xc8] sm:$0xff]  ;;  %v286_v23 = vld [vmem:[#allocation5 + $0xd8] sm:$0xff]  ;;  %v2878_v25 = vpack.c.bf16 %v279_v17, %v275_v16 }
  0x3a   :  { %1941 = vmatmul.mubr.msk.f32.vlgmr.msra.gmra.mrb[0].mxu0 %vm113_vm0, %v58_v63  ;;  %v288_v22 = vld [vmem:[#allocation5 + $0xe8] sm:$0xff]  ;;  %v290_v24 = vld [vmem:[#allocation5 + $0xf8] sm:$0xff]  ;;  %v2882_v26 = vpack.c.bf16 %v281_v20, %v277_v18  ;;  %v283_v28 = vld [vmem:[#allocation5 + $0xc0] sm:$0xff] }
  0x3b   :  { %1942 = vmatmul.mubr.msk.f32.vlgmr.msra.gmra.mrb[0].mxu1 %vm113_vm0, %v58_v63  ;;  %2060 = vmatpush1.bf16.msra.mxu0 %v2851_v1  ;;  %v2884_v27 = vpack.c.bf16 %v288_v22, %v284_v21  ;;  %v287_v29 = vld [vmem:[#allocation5 + $0xe0] sm:$0xff]  ;;  %v285_v30 = vld [vmem:[#allocation5 + $0xd0] sm:$0xff]  ;;  %v2887_v31 = vpack.c.bf16 %v290_v24, %v286_v23  ;;  %v292_v33 = vld [vmem:[#allocation5 + $0x108] sm:$0xff] }
  0x3c   :  { %2092 = vmatpush1.bf16.msra.mxu1 %v2854_v2  ;;  %2062 = vmatprep.subr.bf16.mxu0 %v2856_v3  ;;  %v289_v32 = vld [vmem:[#allocation5 + $0xf0] sm:$0xff]  ;;  %v296_v34 = vld [vmem:[#allocation5 + $0x128] sm:$0xff]  ;;  %v294_v35 = vld [vmem:[#allocation5 + $0x118] sm:$0xff]  ;;  %v2890_v37 = vpack.c.bf16 %v287_v29, %v283_v28 }
  0x3d   :  { %2094 = vmatprep.subr.bf16.mxu1 %v2859_v7  ;;  %387 = vmatprep.mubr.f32.mxu0 %v2769_v0  ;;  %v298_v36 = vld [vmem:[#allocation5 + $0x138] sm:$0xff]  ;;  %v2894_v38 = vpack.c.bf16 %v289_v32, %v285_v30  ;;  %v2896_v39 = vpack.c.bf16 %v296_v34, %v292_v33  ;;  %v291_v40 = vld [vmem:[#allocation5 + $0x100] sm:$0xff]  ;;  %v293_v42 = vld [vmem:[#allocation5 + $0x110] sm:$0xff] }
  0x3e   :  { %458 = vmatprep.mubr.f32.mxu1 %v2769_v0  ;;  %v295_v41 = vld [vmem:[#allocation5 + $0x120] sm:$0xff]  ;;  %v2899_v43 = vpack.c.bf16 %v298_v36, %v294_v35  ;;  %v297_v44 = vld [vmem:[#allocation5 + $0x130] sm:$0xff]  ;;  %v300_v45 = vld [vmem:[#allocation5 + $0x148] sm:$0xff] }
  0x3f   :  { %2064 = vmatpush1.bf16.msra.mxu0 %v2864_v13  ;;  %v304_v46 = vld [vmem:[#allocation5 + $0x168] sm:$0xff]  ;;  %v302_v47 = vld [vmem:[#allocation5 + $0x158] sm:$0xff]  ;;  %v2902_v49 = vpack.c.bf16 %v295_v41, %v291_v40  ;;  %v2906_v50 = vpack.c.bf16 %v297_v44, %v293_v42  ;;  %v299_v52 = vld [vmem:[#allocation5 + $0x140] sm:$0xff]  ;;  %v93_v41 = vlaneseq }
  0x40   :  { %2096 = vmatpush1.bf16.msra.mxu1 %v2868_v14  ;;  %2066 = vmatprep.subr.bf16.mxu0 %v2870_v15  ;;  %v306_v48 = vld [vmem:[#allocation5 + $0x178] sm:$0xff]  ;;  %v2908_v51 = vpack.c.bf16 %v304_v46, %v300_v45  ;;  %v303_v54 = vld [vmem:[#allocation5 + $0x160] sm:$0xff]  ;;  %v301_v55 = vld [vmem:[#allocation5 + $0x150] sm:$0xff] }
  0x41   :  { %2098 = vmatprep.subr.bf16.mxu1 %v2873_v19  ;;  %v2911_v56 = vpack.c.bf16 %v306_v48, %v302_v47  ;;  %v305_v58 = vld [vmem:[#allocation5 + $0x170] sm:$0xff]  ;;  %v308_v59 = vld [vmem:[#allocation5 + $0x188] sm:$0xff]  ;;  %v310_v61 = vld [vmem:[#allocation5 + $0x198] sm:$0xff]  ;;  %v2914_v63 = vpack.c.bf16 %v303_v54, %v299_v52  ;;  %v94_v42 = vshrl.u32 %v93_v41, 7 }
  0x42   :  { %v312_v60 = vld [vmem:[#allocation5 + $0x1a8] sm:$0xff]  ;;  %v314_v62 = vld [vmem:[#allocation5 + $0x1b8] sm:$0xff]  ;;  %v2918_v4 = vpack.c.bf16 %v305_v58, %v301_v55  ;;  %v307_v6 = vld [vmem:[#allocation5 + $0x180] sm:$0xff] }
  0x43   :  { %2068 = vmatpush1.bf16.msra.mxu0 %v2878_v25  ;;  %v2920_v5 = vpack.c.bf16 %v312_v60, %v308_v59  ;;  %v311_v8 = vld [vmem:[#allocation5 + $0x1a0] sm:$0xff]  ;;  %v309_v9 = vld [vmem:[#allocation5 + $0x190] sm:$0xff]  ;;  %v2923_v10 = vpack.c.bf16 %v314_v62, %v310_v61  ;;  %v316_v12 = vld [vmem:[#allocation5 + $0x1c8] sm:$0xff]  ;;  %v95_v44 = vsub.s32 0, %v94_v42  ;;  %v99_v46 = vsub.s32 1, %v94_v42 }
  0x44   :  { %2100 = vmatpush1.bf16.msra.mxu1 %v2882_v26  ;;  %2070 = vmatprep.subr.bf16.mxu0 %v2884_v27  ;;  %v313_v11 = vld [vmem:[#allocation5 + $0x1b0] sm:$0xff]  ;;  %v320_v16 = vld [vmem:[#allocation5 + $0x1e8] sm:$0xff]  ;;  %v318_v17 = vld [vmem:[#allocation5 + $0x1d8] sm:$0xff]  ;;  %v2926_v20 = vpack.c.bf16 %v311_v8, %v307_v6  ;;  %v103_v47 = vsub.s32 2, %v94_v42  ;;  %v107_v8 = vsub.s32 3, %v94_v42 }
  0x45   :  { %2102 = vmatprep.subr.bf16.mxu1 %v2887_v31  ;;  %v322_v18 = vld [vmem:[#allocation5 + $0x1f8] sm:$0xff]  ;;  %v2930_v21 = vpack.c.bf16 %v313_v11, %v309_v9  ;;  %v2932_v22 = vpack.c.bf16 %v320_v16, %v316_v12  ;;  %v315_v23 = vld [vmem:[#allocation5 + $0x1c0] sm:$0xff]  ;;  %v317_v29 = vld [vmem:[#allocation5 + $0x1d0] sm:$0xff] }
  0x46   :  { %v319_v24 = vld [vmem:[#allocation5 + $0x1e0] sm:$0xff]  ;;  %v2935_v28 = vpack.c.bf16 %v322_v18, %v318_v17  ;;  %v321_v30 = vld [vmem:[#allocation5 + $0x1f0] sm:$0xff] }
  0x47   :  { %2072 = vmatpush1.bf16.msra.mxu0 %v2890_v37  ;;  %v2938_v32 = vpack.c.bf16 %v319_v24, %v315_v23  ;;  %v2942_v33 = vpack.c.bf16 %v321_v30, %v317_v29  ;;  %v91_v45 = vld [vmem:[%s3377_s2] sm:$0xf]  ;;  %s1931_s2 = sshll.u32 %s2772_s9, 4  ;;  %s1932_s2 = int_to_ptr.vmem [resolvable:$true] %s1931_s2 }
  0x48   :  { %2104 = vmatpush1.bf16.msra.mxu1 %v2894_v38  ;;  %2074 = vmatprep.subr.bf16.mxu0 %v2896_v39  ;;  %v96_v48 = vrot.slane %v91_v45, %v95_v44  ;;  %v100_v52 = vrot.slane %v91_v45, %v99_v46  ;;  %v104_v54 = vrot.slane %v91_v45, %v103_v47  ;;  %p2742_p3 = scmp.lt.s32.totalorder %s1932_s2, %s1932_s2 }
  0x49   :  { %2106 = vmatprep.subr.bf16.mxu1 %v2899_v43  ;;  %v108_v16 = vrot.slane %v91_v45, %v107_v8 }
  0x4b   :  { %2076 = vmatpush1.bf16.msra.mxu0 %v2902_v49 }
  0x4c   :  { %2108 = vmatpush1.bf16.msra.mxu1 %v2906_v50  ;;  %2078 = vmatprep.subr.bf16.mxu0 %v2908_v51 }
  0x4d   :  { %2110 = vmatprep.subr.bf16.mxu1 %v2911_v56 }
  0x4f   :  { %2080 = vmatpush1.bf16.msra.mxu0 %v2914_v63 }
  0x50   :  { %2112 = vmatpush1.bf16.msra.mxu1 %v2918_v4  ;;  %2082 = vmatprep.subr.bf16.mxu0 %v2920_v5 }
  0x51   :  { %2114 = vmatprep.subr.bf16.mxu1 %v2923_v10 }
  0x53   :  { %2084 = vmatpush1.bf16.msra.mxu0 %v2926_v20 }
  0x54   :  { %2116 = vmatpush1.bf16.msra.mxu1 %v2930_v21  ;;  %2086 = vmatprep.subr.bf16.mxu0 %v2932_v22 }
  0x55   :  { %2118 = vmatprep.subr.bf16.mxu1 %v2935_v28 }
  0x57   :  { %2088 = vmatpush1.bf16.msra.mxu0 %v2938_v32 }
  0x58   :  { %2120 = vmatpush1.bf16.msra.mxu1 %v2942_v33  ;;  %2122 = vmatprep.subr.bf16.mxu0 %v2844_v53 }
  0x59   :  { %2154 = vmatprep.subr.bf16.mxu1 %v2846_v57 }
  0x5a   :  { %388 = vmatmul.mubr.f32.vlgmr.msra.gmra.mrb[2].mxu0 %v2769_v0 }
  0x5b   :  { %459 = vmatmul.mubr.f32.vlgmr.msra.gmra.mrb[2].mxu1 %v2769_v0  ;;  %2124 = vmatpush1.bf16.msra.mxu0 %v2851_v1 }
  0x5c   :  { %2156 = vmatpush1.bf16.msra.mxu1 %v2854_v2  ;;  %2126 = vmatprep.subr.bf16.mxu0 %v2856_v3 }
  0x5d   :  { %2158 = vmatprep.subr.bf16.mxu1 %v2859_v7  ;;  %548 = vmatprep.mubr.f32.mxu0 %v2769_v0 }
  0x5e   :  { %619 = vmatprep.mubr.f32.mxu1 %v2769_v0 }
  0x5f   :  { %2128 = vmatpush1.bf16.msra.mxu0 %v2864_v13 }
  0x60   :  { %2160 = vmatpush1.bf16.msra.mxu1 %v2868_v14  ;;  %2130 = vmatprep.subr.bf16.mxu0 %v2870_v15 }
  0x61   :  { %2162 = vmatprep.subr.bf16.mxu1 %v2873_v19 }
  0x63   :  { %2132 = vmatpush1.bf16.msra.mxu0 %v2878_v25 }
  0x64   :  { %2164 = vmatpush1.bf16.msra.mxu1 %v2882_v26  ;;  %2134 = vmatprep.subr.bf16.mxu0 %v2884_v27 }
  0x65   :  { %2166 = vmatprep.subr.bf16.mxu1 %v2887_v31 }
  0x67   :  { %2136 = vmatpush1.bf16.msra.mxu0 %v2890_v37 }
  0x68   :  { %2168 = vmatpush1.bf16.msra.mxu1 %v2894_v38  ;;  %2138 = vmatprep.subr.bf16.mxu0 %v2896_v39 }
  0x69   :  { %2170 = vmatprep.subr.bf16.mxu1 %v2899_v43 }
  0x6b   :  { %2140 = vmatpush1.bf16.msra.mxu0 %v2902_v49 }
  0x6c   :  { %2172 = vmatpush1.bf16.msra.mxu1 %v2906_v50  ;;  %2142 = vmatprep.subr.bf16.mxu0 %v2908_v51 }
  0x6d   :  { %2174 = vmatprep.subr.bf16.mxu1 %v2911_v56 }
  0x6f   :  { %2144 = vmatpush1.bf16.msra.mxu0 %v2914_v63 }
  0x70   :  { %2176 = vmatpush1.bf16.msra.mxu1 %v2918_v4  ;;  %2146 = vmatprep.subr.bf16.mxu0 %v2920_v5 }
  0x71   :  { %2178 = vmatprep.subr.bf16.mxu1 %v2923_v10 }
  0x73   :  { %2148 = vmatpush1.bf16.msra.mxu0 %v2926_v20 }
  0x74   :  { %2180 = vmatpush1.bf16.msra.mxu1 %v2930_v21  ;;  %2150 = vmatprep.subr.bf16.mxu0 %v2932_v22 }
  0x75   :  { %2182 = vmatprep.subr.bf16.mxu1 %v2935_v28 }
  0x77   :  { %2152 = vmatpush1.bf16.msra.mxu0 %v2938_v32 }
  0x78   :  { %2184 = vmatpush1.bf16.msra.mxu1 %v2942_v33  ;;  %2186 = vmatprep.subr.bf16.mxu0 %v2844_v53 }
  0x79   :  { %2218 = vmatprep.subr.bf16.mxu1 %v2846_v57 }
 0x10d   :  { %v183_v34 = vpop.f32.mrb[0].mxu0 }
 0x10e   :  { %v185_v35 = vpop.f32.mrb[1].mxu0  ;;  %v254_v36 = vpop.f32.mrb[0].mxu1  ;;  %v2988_v55 = vadd.f32 %v183_v34, %v96_v48 }
 0x10f   :  { %v256_v40 = vpop.f32.mrb[1].mxu1  ;;  %v2990_v58 = vadd.f32 %v185_v35, %v100_v52  ;;  %v2992_v60 = vadd.f32 %v254_v36, %v104_v54 }
 0x110   :  { %v2997_v17 = vadd.f32 %v256_v40, %v108_v16 }
 0x12d   :  { %v389_v59 = vpop.f32.mrb[2].mxu0 }
 0x12e   :  { %v465_v61 = vadd.f32 %v389_v59, %v2988_v55  ;;  %v460_v62 = vpop.f32.mrb[2].mxu1  ;;  %v391_v6 = vpop.f32.mrb[3].mxu0 }
 0x12f   :  { %v466_v9 = vadd.f32 %v391_v6, %v2990_v58  ;;  %v462_v11 = vpop.f32.mrb[3].mxu1  ;;  %v467_v12 = vadd.f32 %v460_v62, %v2992_v60 }
 0x130   :  { %2613 = vtanh.f32 %v465_v61  ;;  %v468_v18 = vadd.f32 %v462_v11, %v2997_v17 }
 0x131   :  { %2615 = vtanh.f32 %v466_v9 }
 0x132   :  { %2617 = vtanh.f32 %v467_v12 }
 0x133   :  { %2619 = vtanh.f32 %v468_v18 }
 0x13a   :  { %v2614_v23 = vpop.eup %2613 }
 0x13b   :  { %v473_v24 = vmul.f32 0.5, %v2614_v23  ;;  %v2616_v29 = vpop.eup %2615 }
 0x13c   :  { %v475_v34 = vmul.f32 0.5, %v2616_v29  ;;  %v2618_v35 = vpop.eup %2617 }
 0x13d   :  { %v474_v30 = vadd.f32 0.5, %v473_v24  ;;  %v2620_v45 = vpop.eup %2619 }
 0x13e   :  { %v476_v36 = vadd.f32 0.5, %v475_v34  ;;  %v477_v46 = vmul.f32 0.5, %v2620_v45 }
 0x13f   :  { %v480_v41 = vmul.f32 %v2618_v35, %v474_v30 }
 0x140   :  { %v479_v42 = vmul.f32 0.0, %v476_v36  ;;  %v478_v40 = vadd.f32 0.5, %v477_v46 }
 0x142   :  { %v3000_v44 = vadd.f32 %v480_v41, %v479_v42 }
 0x144   :  { %2621 = vtanh.f32 %v3000_v44  ;;  %v653_v36 = vrot.slane %v3000_v44, 7 }
 0x14e   :  { %v2622_v47 = vpop.eup %2621 }
 0x14f   :  { %v3003_v48 = vmul.f32 %v2622_v47, %v478_v40 }
 0x151   :  { %549 = vmatmul.mubr.f32.vlgmr.msra.gmra.mrb[4].mxu0 %v3003_v48  ;;  %620 = vmatmul.mubr.f32.vlgmr.msra.gmra.mrb[4].mxu1 %v3003_v48 }
 0x152   :  { %2188 = vmatpush1.bf16.msra.mxu0 %v2851_v1  ;;  %2220 = vmatpush1.bf16.msra.mxu1 %v2854_v2 }
 0x153   :  { %2190 = vmatprep.subr.bf16.mxu0 %v2856_v3  ;;  %2222 = vmatprep.subr.bf16.mxu1 %v2859_v7 }
 0x154   :  { %727 = vmatprep.mubr.f32.mxu0 %v2769_v0  ;;  %798 = vmatprep.mubr.f32.mxu1 %v2769_v0 }
 0x156   :  { %2192 = vmatpush1.bf16.msra.mxu0 %v2864_v13  ;;  %2224 = vmatpush1.bf16.msra.mxu1 %v2868_v14 }
 0x157   :  { %2194 = vmatprep.subr.bf16.mxu0 %v2870_v15  ;;  %2226 = vmatprep.subr.bf16.mxu1 %v2873_v19 }
 0x15a   :  { %2196 = vmatpush1.bf16.msra.mxu0 %v2878_v25  ;;  %2228 = vmatpush1.bf16.msra.mxu1 %v2882_v26 }
 0x15b   :  { %2198 = vmatprep.subr.bf16.mxu0 %v2884_v27  ;;  %2230 = vmatprep.subr.bf16.mxu1 %v2887_v31 }
 0x15e   :  { %2200 = vmatpush1.bf16.msra.mxu0 %v2890_v37  ;;  %2232 = vmatpush1.bf16.msra.mxu1 %v2894_v38 }
 0x15f   :  { %2202 = vmatprep.subr.bf16.mxu0 %v2896_v39  ;;  %2234 = vmatprep.subr.bf16.mxu1 %v2899_v43 }
 0x162   :  { %2204 = vmatpush1.bf16.msra.mxu0 %v2902_v49  ;;  %2236 = vmatpush1.bf16.msra.mxu1 %v2906_v50 }
 0x163   :  { %2206 = vmatprep.subr.bf16.mxu0 %v2908_v51  ;;  %2238 = vmatprep.subr.bf16.mxu1 %v2911_v56 }
 0x166   :  { %2208 = vmatpush1.bf16.msra.mxu0 %v2914_v63  ;;  %2240 = vmatpush1.bf16.msra.mxu1 %v2918_v4 }
 0x167   :  { %2210 = vmatprep.subr.bf16.mxu0 %v2920_v5  ;;  %2242 = vmatprep.subr.bf16.mxu1 %v2923_v10 }
 0x16a   :  { %2212 = vmatpush1.bf16.msra.mxu0 %v2926_v20  ;;  %2244 = vmatpush1.bf16.msra.mxu1 %v2930_v21 }
 0x16b   :  { %2214 = vmatprep.subr.bf16.mxu0 %v2932_v22  ;;  %2246 = vmatprep.subr.bf16.mxu1 %v2935_v28 }
 0x16e   :  { %2216 = vmatpush1.bf16.msra.mxu0 %v2938_v32  ;;  %2248 = vmatpush1.bf16.msra.mxu1 %v2942_v33 }
 0x16f   :  { %2250 = vmatprep.subr.bf16.mxu0 %v2844_v53  ;;  %2282 = vmatprep.subr.bf16.mxu1 %v2846_v57 }
 0x224   :  { %v550_v52 = vpop.f32.mrb[4].mxu0  ;;  %v621_v54 = vpop.f32.mrb[4].mxu1 }
 0x225   :  { %v630_v59 = vrot.slane %v550_v52, 7  ;;  %v632_v61 = vrot.slane %v621_v54, 7  ;;  %v552_v62 = vpop.f32.mrb[5].mxu0  ;;  %v623_v6 = vpop.f32.mrb[5].mxu1 }
 0x226   :  { %v631_v8 = vrot.slane %v552_v62, 7  ;;  %v633_v16 = vrot.slane %v623_v6, 7 }
 0x227   :  { %v638_v9 = vadd.f32 %v630_v59, %v2988_v55  ;;  %v640_v12 = vadd.f32 %v632_v61, %v2992_v60 }
 0x228   :  { %v639_v11 = vadd.f32 %v631_v8, %v2990_v58  ;;  %v641_v18 = vadd.f32 %v633_v16, %v2997_v17 }
 0x229   :  { %2623 = vtanh.f32 %v638_v9 }
 0x22a   :  { %2625 = vtanh.f32 %v639_v11 }
 0x22b   :  { %2627 = vtanh.f32 %v640_v12 }
 0x22c   :  { %2629 = vtanh.f32 %v641_v18 }
 0x233   :  { %v2624_v23 = vpop.eup %2623 }
 0x234   :  { %v646_v24 = vmul.f32 0.5, %v2624_v23  ;;  %v2626_v29 = vpop.eup %2625 }
 0x235   :  { %v648_v34 = vmul.f32 0.5, %v2626_v29  ;;  %v2628_v35 = vpop.eup %2627 }
 0x236   :  { %v647_v30 = vadd.f32 0.5, %v646_v24  ;;  %v2630_v40 = vpop.eup %2629 }
 0x237   :  { %v649_v41 = vadd.f32 0.5, %v648_v34  ;;  %v650_v47 = vmul.f32 0.5, %v2630_v40 }
 0x238   :  { %v656_v42 = vmul.f32 %v2628_v35, %v647_v30 }
 0x239   :  { %v655_v45 = vmul.f32 %v653_v36, %v649_v41  ;;  %v651_v52 = vadd.f32 0.5, %v650_v47 }
 0x23b   :  { %v3046_v46 = vadd.f32 %v656_v42, %v655_v45 }
 0x23d   :  { %2631 = vtanh.f32 %v3046_v46  ;;  %v832_v40 = vrot.slane %v3046_v46, 7 }
 0x247   :  { %v2632_v54 = vpop.eup %2631 }
 0x248   :  { %v3049_v59 = vmul.f32 %v2632_v54, %v651_v52 }
 0x24a   :  { %v661_v61 = vrot.slane %v3049_v59, 1 }
 0x24c   :  { %728 = vmatmul.mubr.f32.vlgmr.msra.gmra.mrb[6].mxu0 %v661_v61  ;;  %799 = vmatmul.mubr.f32.vlgmr.msra.gmra.mrb[6].mxu1 %v661_v61 }
 0x24d   :  { %2252 = vmatpush1.bf16.msra.mxu0 %v2851_v1  ;;  %2284 = vmatpush1.bf16.msra.mxu1 %v2854_v2 }
 0x24e   :  { %2254 = vmatprep.subr.bf16.mxu0 %v2856_v3  ;;  %2286 = vmatprep.subr.bf16.mxu1 %v2859_v7 }
 0x24f   :  { %906 = vmatprep.mubr.f32.mxu0 %v2769_v0  ;;  %977 = vmatprep.mubr.f32.mxu1 %v2769_v0 }
 0x251   :  { %2256 = vmatpush1.bf16.msra.mxu0 %v2864_v13  ;;  %2288 = vmatpush1.bf16.msra.mxu1 %v2868_v14 }
 0x252   :  { %2258 = vmatprep.subr.bf16.mxu0 %v2870_v15  ;;  %2290 = vmatprep.subr.bf16.mxu1 %v2873_v19 }
 0x255   :  { %2260 = vmatpush1.bf16.msra.mxu0 %v2878_v25  ;;  %2292 = vmatpush1.bf16.msra.mxu1 %v2882_v26 }
 0x256   :  { %2262 = vmatprep.subr.bf16.mxu0 %v2884_v27  ;;  %2294 = vmatprep.subr.bf16.mxu1 %v2887_v31 }
 0x259   :  { %2264 = vmatpush1.bf16.msra.mxu0 %v2890_v37  ;;  %2296 = vmatpush1.bf16.msra.mxu1 %v2894_v38 }
 0x25a   :  { %2266 = vmatprep.subr.bf16.mxu0 %v2896_v39  ;;  %2298 = vmatprep.subr.bf16.mxu1 %v2899_v43 }
 0x25d   :  { %2268 = vmatpush1.bf16.msra.mxu0 %v2902_v49  ;;  %2300 = vmatpush1.bf16.msra.mxu1 %v2906_v50 }
 0x25e   :  { %2270 = vmatprep.subr.bf16.mxu0 %v2908_v51  ;;  %2302 = vmatprep.subr.bf16.mxu1 %v2911_v56 }
 0x261   :  { %2272 = vmatpush1.bf16.msra.mxu0 %v2914_v63  ;;  %2304 = vmatpush1.bf16.msra.mxu1 %v2918_v4 }
 0x262   :  { %2274 = vmatprep.subr.bf16.mxu0 %v2920_v5  ;;  %2306 = vmatprep.subr.bf16.mxu1 %v2923_v10 }
 0x265   :  { %2276 = vmatpush1.bf16.msra.mxu0 %v2926_v20  ;;  %2308 = vmatpush1.bf16.msra.mxu1 %v2930_v21 }
 0x266   :  { %2278 = vmatprep.subr.bf16.mxu0 %v2932_v22  ;;  %2310 = vmatprep.subr.bf16.mxu1 %v2935_v28 }
 0x269   :  { %2280 = vmatpush1.bf16.msra.mxu0 %v2938_v32  ;;  %2312 = vmatpush1.bf16.msra.mxu1 %v2942_v33 }
 0x26a   :  { %2314 = vmatprep.subr.bf16.mxu0 %v2844_v53  ;;  %2346 = vmatprep.subr.bf16.mxu1 %v2846_v57 }
 0x31f   :  { %v729_v44 = vpop.f32.mrb[6].mxu0  ;;  %v800_v62 = vpop.f32.mrb[6].mxu1 }
 0x320   :  { %v809_v6 = vrot.slane %v729_v44, 6  ;;  %v811_v8 = vrot.slane %v800_v62, 6  ;;  %v731_v9 = vpop.f32.mrb[7].mxu0  ;;  %v802_v11 = vpop.f32.mrb[7].mxu1 }
 0x321   :  { %v810_v12 = vrot.slane %v731_v9, 6  ;;  %v812_v24 = vrot.slane %v802_v11, 6  ;;  %v1735_v9 = vsel %vm1734_vm1, %v3003_v48, %v3049_v59 }
 0x322   :  { %v817_v16 = vadd.f32 %v809_v6, %v2988_v55  ;;  %v819_v23 = vadd.f32 %v811_v8, %v2992_v60 }
 0x323   :  { %v818_v18 = vadd.f32 %v810_v12, %v2990_v58  ;;  %v820_v29 = vadd.f32 %v812_v24, %v2997_v17 }
 0x324   :  { %2633 = vtanh.f32 %v817_v16 }
 0x325   :  { %2635 = vtanh.f32 %v818_v18 }
 0x326   :  { %2637 = vtanh.f32 %v819_v23 }
 0x327   :  { %2639 = vtanh.f32 %v820_v29 }
 0x32e   :  { %v2634_v30 = vpop.eup %2633 }
 0x32f   :  { %v825_v34 = vmul.f32 0.5, %v2634_v30  ;;  %v2636_v35 = vpop.eup %2635 }
 0x330   :  { %v827_v41 = vmul.f32 0.5, %v2636_v35  ;;  %v2638_v42 = vpop.eup %2637 }
 0x331   :  { %v826_v36 = vadd.f32 0.5, %v825_v34  ;;  %v2640_v61 = vpop.eup %2639 }
 0x332   :  { %v828_v45 = vadd.f32 0.5, %v827_v41  ;;  %v829_v44 = vmul.f32 0.5, %v2640_v61 }
 0x333   :  { %v835_v47 = vmul.f32 %v2638_v42, %v826_v36 }
 0x334   :  { %v834_v52 = vmul.f32 %v832_v40, %v828_v45  ;;  %v830_v62 = vadd.f32 0.5, %v829_v44 }
 0x336   :  { %v3091_v54 = vadd.f32 %v835_v47, %v834_v52 }
 0x338   :  { %2641 = vtanh.f32 %v3091_v54  ;;  %v1011_v44 = vrot.slane %v3091_v54, 7 }
 0x342   :  { %v2642_v6 = vpop.eup %2641 }
 0x343   :  { %v838_v8 = vmul.f32 %v2642_v6, %v830_v62 }
 0x345   :  { %v3096_v11 = vsel %vm1736_vm2, %v1735_v9, %v838_v8  ;;  %v840_v12 = vrot.slane %v838_v8, 2 }
 0x347   :  { %907 = vmatmul.mubr.f32.vlgmr.msra.gmra.mrb[8].mxu0 %v840_v12  ;;  %978 = vmatmul.mubr.f32.vlgmr.msra.gmra.mrb[8].mxu1 %v840_v12 }
 0x348   :  { %2316 = vmatpush1.bf16.msra.mxu0 %v2851_v1  ;;  %2348 = vmatpush1.bf16.msra.mxu1 %v2854_v2 }
 0x349   :  { %2318 = vmatprep.subr.bf16.mxu0 %v2856_v3  ;;  %2350 = vmatprep.subr.bf16.mxu1 %v2859_v7 }
 0x34a   :  { %1085 = vmatprep.mubr.f32.mxu0 %v2769_v0  ;;  %1156 = vmatprep.mubr.f32.mxu1 %v2769_v0 }
 0x34c   :  { %2320 = vmatpush1.bf16.msra.mxu0 %v2864_v13  ;;  %2352 = vmatpush1.bf16.msra.mxu1 %v2868_v14 }
 0x34d   :  { %2322 = vmatprep.subr.bf16.mxu0 %v2870_v15  ;;  %2354 = vmatprep.subr.bf16.mxu1 %v2873_v19 }
 0x350   :  { %2324 = vmatpush1.bf16.msra.mxu0 %v2878_v25  ;;  %2356 = vmatpush1.bf16.msra.mxu1 %v2882_v26 }
 0x351   :  { %2326 = vmatprep.subr.bf16.mxu0 %v2884_v27  ;;  %2358 = vmatprep.subr.bf16.mxu1 %v2887_v31 }
 0x354   :  { %2328 = vmatpush1.bf16.msra.mxu0 %v2890_v37  ;;  %2360 = vmatpush1.bf16.msra.mxu1 %v2894_v38 }
 0x355   :  { %2330 = vmatprep.subr.bf16.mxu0 %v2896_v39  ;;  %2362 = vmatprep.subr.bf16.mxu1 %v2899_v43 }
 0x358   :  { %2332 = vmatpush1.bf16.msra.mxu0 %v2902_v49  ;;  %2364 = vmatpush1.bf16.msra.mxu1 %v2906_v50 }
 0x359   :  { %2334 = vmatprep.subr.bf16.mxu0 %v2908_v51  ;;  %2366 = vmatprep.subr.bf16.mxu1 %v2911_v56 }
 0x35c   :  { %2336 = vmatpush1.bf16.msra.mxu0 %v2914_v63  ;;  %2368 = vmatpush1.bf16.msra.mxu1 %v2918_v4 }
 0x35d   :  { %2338 = vmatprep.subr.bf16.mxu0 %v2920_v5  ;;  %2370 = vmatprep.subr.bf16.mxu1 %v2923_v10 }
 0x360   :  { %2340 = vmatpush1.bf16.msra.mxu0 %v2926_v20  ;;  %2372 = vmatpush1.bf16.msra.mxu1 %v2930_v21 }
 0x361   :  { %2342 = vmatprep.subr.bf16.mxu0 %v2932_v22  ;;  %2374 = vmatprep.subr.bf16.mxu1 %v2935_v28 }
 0x364   :  { %2344 = vmatpush1.bf16.msra.mxu0 %v2938_v32  ;;  %2376 = vmatpush1.bf16.msra.mxu1 %v2942_v33 }
 0x365   :  { %2378 = vmatprep.subr.bf16.mxu0 %v2844_v53  ;;  %2410 = vmatprep.subr.bf16.mxu1 %v2846_v57 }
 0x41a   :  { %v908_v48 = vpop.f32.mrb[8].mxu0  ;;  %v979_v46 = vpop.f32.mrb[8].mxu1 }
 0x41b   :  { %v988_v59 = vrot.slane %v908_v48, 5  ;;  %v990_v16 = vrot.slane %v979_v46, 5  ;;  %v910_v18 = vpop.f32.mrb[9].mxu0  ;;  %v981_v23 = vpop.f32.mrb[9].mxu1 }
 0x41c   :  { %v989_v24 = vrot.slane %v910_v18, 5  ;;  %v991_v35 = vrot.slane %v981_v23, 5 }
 0x41d   :  { %v996_v29 = vadd.f32 %v988_v59, %v2988_v55  ;;  %v998_v34 = vadd.f32 %v990_v16, %v2992_v60 }
 0x41e   :  { %v997_v30 = vadd.f32 %v989_v24, %v2990_v58  ;;  %v999_v36 = vadd.f32 %v991_v35, %v2997_v17 }
 0x41f   :  { %2643 = vtanh.f32 %v996_v29 }
 0x420   :  { %2645 = vtanh.f32 %v997_v30 }
 0x421   :  { %2647 = vtanh.f32 %v998_v34 }
 0x422   :  { %2649 = vtanh.f32 %v999_v36 }
 0x429   :  { %v2644_v41 = vpop.eup %2643 }
 0x42a   :  { %v1004_v42 = vmul.f32 0.5, %v2644_v41  ;;  %v2646_v45 = vpop.eup %2645 }
 0x42b   :  { %v1006_v47 = vmul.f32 0.5, %v2646_v45  ;;  %v2648_v52 = vpop.eup %2647 }
 0x42c   :  { %v1005_v40 = vadd.f32 0.5, %v1004_v42  ;;  %v2650_v9 = vpop.eup %2649 }
 0x42d   :  { %v1007_v61 = vadd.f32 0.5, %v1006_v47  ;;  %v1008_v12 = vmul.f32 0.5, %v2650_v9 }
 0x42e   :  { %v1014_v62 = vmul.f32 %v2648_v52, %v1005_v40 }
 0x42f   :  { %v1013_v6 = vmul.f32 %v1011_v44, %v1007_v61  ;;  %v1009_v48 = vadd.f32 0.5, %v1008_v12 }
 0x431   :  { %v3137_v8 = vadd.f32 %v1014_v62, %v1013_v6 }
 0x433   :  { %2651 = vtanh.f32 %v3137_v8  ;;  %v1190_v9 = vrot.slane %v3137_v8, 7 }
 0x43d   :  { %v2652_v46 = vpop.eup %2651 }
 0x43e   :  { %v1017_v59 = vmul.f32 %v2652_v46, %v1009_v48 }
 0x440   :  { %v1019_v16 = vrot.slane %v1017_v59, 3  ;;  %v3141_v18 = vsel %vm1738_vm3, %v3096_v11, %v1017_v59 }
 0x442   :  { %1086 = vmatmul.mubr.f32.vlgmr.msra.gmra.mrb[10].mxu0 %v1019_v16  ;;  %1157 = vmatmul.mubr.f32.vlgmr.msra.gmra.mrb[10].mxu1 %v1019_v16 }
 0x443   :  { %2380 = vmatpush1.bf16.msra.mxu0 %v2851_v1  ;;  %2412 = vmatpush1.bf16.msra.mxu1 %v2854_v2 }
 0x444   :  { %2382 = vmatprep.subr.bf16.mxu0 %v2856_v3  ;;  %2414 = vmatprep.subr.bf16.mxu1 %v2859_v7 }
 0x445   :  { %1264 = vmatprep.mubr.f32.mxu0 %v2769_v0  ;;  %1335 = vmatprep.mubr.f32.mxu1 %v2769_v0 }
 0x447   :  { %2384 = vmatpush1.bf16.msra.mxu0 %v2864_v13  ;;  %2416 = vmatpush1.bf16.msra.mxu1 %v2868_v14 }
 0x448   :  { %2386 = vmatprep.subr.bf16.mxu0 %v2870_v15  ;;  %2418 = vmatprep.subr.bf16.mxu1 %v2873_v19 }
 0x44b   :  { %2388 = vmatpush1.bf16.msra.mxu0 %v2878_v25  ;;  %2420 = vmatpush1.bf16.msra.mxu1 %v2882_v26 }
 0x44c   :  { %2390 = vmatprep.subr.bf16.mxu0 %v2884_v27  ;;  %2422 = vmatprep.subr.bf16.mxu1 %v2887_v31 }
 0x44f   :  { %2392 = vmatpush1.bf16.msra.mxu0 %v2890_v37  ;;  %2424 = vmatpush1.bf16.msra.mxu1 %v2894_v38 }
 0x450   :  { %2394 = vmatprep.subr.bf16.mxu0 %v2896_v39  ;;  %2426 = vmatprep.subr.bf16.mxu1 %v2899_v43 }
 0x453   :  { %2396 = vmatpush1.bf16.msra.mxu0 %v2902_v49  ;;  %2428 = vmatpush1.bf16.msra.mxu1 %v2906_v50 }
 0x454   :  { %2398 = vmatprep.subr.bf16.mxu0 %v2908_v51  ;;  %2430 = vmatprep.subr.bf16.mxu1 %v2911_v56 }
 0x457   :  { %2400 = vmatpush1.bf16.msra.mxu0 %v2914_v63  ;;  %2432 = vmatpush1.bf16.msra.mxu1 %v2918_v4 }
 0x458   :  { %2402 = vmatprep.subr.bf16.mxu0 %v2920_v5  ;;  %2434 = vmatprep.subr.bf16.mxu1 %v2923_v10 }
 0x45b   :  { %2404 = vmatpush1.bf16.msra.mxu0 %v2926_v20  ;;  %2436 = vmatpush1.bf16.msra.mxu1 %v2930_v21 }
 0x45c   :  { %2406 = vmatprep.subr.bf16.mxu0 %v2932_v22  ;;  %2438 = vmatprep.subr.bf16.mxu1 %v2935_v28 }
 0x45f   :  { %2408 = vmatpush1.bf16.msra.mxu0 %v2938_v32  ;;  %2440 = vmatpush1.bf16.msra.mxu1 %v2942_v33 }
 0x460   :  { %2442 = vmatprep.subr.bf16.mxu0 %v2844_v53  ;;  %2474 = vmatprep.subr.bf16.mxu1 %v2846_v57 }
 0x515   :  { %v1087_v54 = vpop.f32.mrb[10].mxu0  ;;  %v1158_v11 = vpop.f32.mrb[10].mxu1 }
 0x516   :  { %v1167_v23 = vrot.slane %v1087_v54, 4  ;;  %v1169_v24 = vrot.slane %v1158_v11, 4  ;;  %v1089_v29 = vpop.f32.mrb[11].mxu0  ;;  %v1160_v30 = vpop.f32.mrb[11].mxu1 }
 0x517   :  { %v1168_v34 = vrot.slane %v1089_v29, 4  ;;  %v1170_v42 = vrot.slane %v1160_v30, 4 }
 0x518   :  { %v1175_v35 = vadd.f32 %v1167_v23, %v2988_v55  ;;  %v1177_v41 = vadd.f32 %v1169_v24, %v2992_v60 }
 0x519   :  { %v1176_v36 = vadd.f32 %v1168_v34, %v2990_v58  ;;  %v1178_v45 = vadd.f32 %v1170_v42, %v2997_v17 }
 0x51a   :  { %2653 = vtanh.f32 %v1175_v35 }
 0x51b   :  { %2655 = vtanh.f32 %v1176_v36 }
 0x51c   :  { %2657 = vtanh.f32 %v1177_v41 }
 0x51d   :  { %2659 = vtanh.f32 %v1178_v45 }
 0x524   :  { %v2654_v40 = vpop.eup %2653 }
 0x525   :  { %v1183_v47 = vmul.f32 0.5, %v2654_v40  ;;  %v2656_v52 = vpop.eup %2655 }
 0x526   :  { %v1185_v44 = vmul.f32 0.5, %v2656_v52  ;;  %v2658_v62 = vpop.eup %2657 }
 0x527   :  { %v1184_v61 = vadd.f32 0.5, %v1183_v47  ;;  %v2660_v59 = vpop.eup %2659 }
 0x528   :  { %v1186_v6 = vadd.f32 0.5, %v1185_v44  ;;  %v1187_v16 = vmul.f32 0.5, %v2660_v59 }
 0x529   :  { %v1193_v12 = vmul.f32 %v2658_v62, %v1184_v61 }
 0x52a   :  { %v1192_v48 = vmul.f32 %v1190_v9, %v1186_v6  ;;  %v1188_v54 = vadd.f32 0.5, %v1187_v16 }
 0x52c   :  { %v3182_v46 = vadd.f32 %v1193_v12, %v1192_v48 }
 0x52e   :  { %2661 = vtanh.f32 %v3182_v46  ;;  %v1369_v12 = vrot.slane %v3182_v46, 7  ;;  %v1748_v46 = vld [vmem:[%s3379_s4] sm:$0xff] }
 0x538   :  { %v2662_v11 = vpop.eup %2661 }
 0x539   :  { %v1196_v23 = vmul.f32 %v2662_v11, %v1188_v54 }
 0x53b   :  { %v1198_v24 = vrot.slane %v1196_v23, 4  ;;  %v3186_v29 = vsel %vm1740_vm4, %v3141_v18, %v1196_v23 }
 0x53d   :  { %1265 = vmatmul.mubr.f32.vlgmr.msra.gmra.mrb[12].mxu0 %v1198_v24  ;;  %1336 = vmatmul.mubr.f32.vlgmr.msra.gmra.mrb[12].mxu1 %v1198_v24 }
 0x53e   :  { %2444 = vmatpush1.bf16.msra.mxu0 %v2851_v1  ;;  %2476 = vmatpush1.bf16.msra.mxu1 %v2854_v2 }
 0x53f   :  { %2446 = vmatprep.subr.bf16.mxu0 %v2856_v3  ;;  %2478 = vmatprep.subr.bf16.mxu1 %v2859_v7 }
 0x540   :  { %1443 = vmatprep.mubr.f32.mxu0 %v2769_v0  ;;  %1514 = vmatprep.mubr.f32.mxu1 %v2769_v0 }
 0x542   :  { %2448 = vmatpush1.bf16.msra.mxu0 %v2864_v13  ;;  %2480 = vmatpush1.bf16.msra.mxu1 %v2868_v14 }
 0x543   :  { %2450 = vmatprep.subr.bf16.mxu0 %v2870_v15  ;;  %2482 = vmatprep.subr.bf16.mxu1 %v2873_v19 }
 0x546   :  { %2452 = vmatpush1.bf16.msra.mxu0 %v2878_v25  ;;  %2484 = vmatpush1.bf16.msra.mxu1 %v2882_v26 }
 0x547   :  { %2454 = vmatprep.subr.bf16.mxu0 %v2884_v27  ;;  %2486 = vmatprep.subr.bf16.mxu1 %v2887_v31 }
 0x54a   :  { %2456 = vmatpush1.bf16.msra.mxu0 %v2890_v37  ;;  %2488 = vmatpush1.bf16.msra.mxu1 %v2894_v38 }
 0x54b   :  { %2458 = vmatprep.subr.bf16.mxu0 %v2896_v39  ;;  %2490 = vmatprep.subr.bf16.mxu1 %v2899_v43 }
 0x54e   :  { %2460 = vmatpush1.bf16.msra.mxu0 %v2902_v49  ;;  %2492 = vmatpush1.bf16.msra.mxu1 %v2906_v50 }
 0x54f   :  { %2462 = vmatprep.subr.bf16.mxu0 %v2908_v51  ;;  %2494 = vmatprep.subr.bf16.mxu1 %v2911_v56 }
 0x552   :  { %2464 = vmatpush1.bf16.msra.mxu0 %v2914_v63  ;;  %2496 = vmatpush1.bf16.msra.mxu1 %v2918_v4 }
 0x553   :  { %2466 = vmatprep.subr.bf16.mxu0 %v2920_v5  ;;  %2498 = vmatprep.subr.bf16.mxu1 %v2923_v10 }
 0x556   :  { %2468 = vmatpush1.bf16.msra.mxu0 %v2926_v20  ;;  %2500 = vmatpush1.bf16.msra.mxu1 %v2930_v21 }
 0x557   :  { %2470 = vmatprep.subr.bf16.mxu0 %v2932_v22  ;;  %2502 = vmatprep.subr.bf16.mxu1 %v2935_v28 }
 0x55a   :  { %2472 = vmatpush1.bf16.msra.mxu0 %v2938_v32  ;;  %2504 = vmatpush1.bf16.msra.mxu1 %v2942_v33 }
 0x55b   :  { %2506 = vmatprep.subr.bf16.mxu0 %v2844_v53  ;;  %2538 = vmatprep.subr.bf16.mxu1 %v2846_v57 }
 0x610   :  { %v1266_v8 = vpop.f32.mrb[12].mxu0  ;;  %v1337_v18 = vpop.f32.mrb[12].mxu1 }
 0x611   :  { %v1346_v30 = vrot.slane %v1266_v8, 3  ;;  %v1348_v34 = vrot.slane %v1337_v18, 3  ;;  %v1268_v35 = vpop.f32.mrb[13].mxu0  ;;  %v1339_v36 = vpop.f32.mrb[13].mxu1 }
 0x612   :  { %v1347_v41 = vrot.slane %v1268_v35, 3  ;;  %v1349_v47 = vrot.slane %v1339_v36, 3  ;;  %v2770_v35 = vmov 0.0|0.0   ;;  %v1750_v36 = vld [vmem:[%s3379_s4 + $0x10] sm:$0xff] }
 0x613   :  { %v1354_v42 = vadd.f32 %v1346_v30, %v2988_v55  ;;  %v1356_v40 = vadd.f32 %v1348_v34, %v2992_v60 }
 0x614   :  { %v1355_v45 = vadd.f32 %v1347_v41, %v2990_v58  ;;  %v1357_v53 = vadd.f32 %v1349_v47, %v2997_v17  ;;  %v1751_v41 = vld [vmem:[%s3379_s4 + $0x18] sm:$0xff] }
 0x615   :  { %2663 = vtanh.f32 %v1354_v42  ;;  %v2573_v42 = vpack.c.bf16 %v1751_v41, %v1750_v36 }
 0x616   :  { %2665 = vtanh.f32 %v1355_v45  ;;  %v1752_v45 = vld [vmem:[%s3379_s4 + $0x20] sm:$0xff] }
 0x617   :  { %2667 = vtanh.f32 %v1356_v40  ;;  %v1753_v40 = vld [vmem:[%s3379_s4 + $0x28] sm:$0xff] }
 0x618   :  { %2669 = vtanh.f32 %v1357_v53  ;;  %v2576_v47 = vpack.c.bf16 %v1753_v40, %v1752_v45  ;;  %v1754_v53 = vld [vmem:[%s3379_s4 + $0x30] sm:$0xff] }
 0x61f   :  { %v2664_v57 = vpop.eup %2663 }
 0x620   :  { %v1362_v52 = vmul.f32 0.5, %v2664_v57  ;;  %v2666_v61 = vpop.eup %2665  ;;  %v1755_v57 = vld [vmem:[%s3379_s4 + $0x38] sm:$0xff] }
 0x621   :  { %v1364_v62 = vmul.f32 0.5, %v2666_v61  ;;  %v2668_v6 = vpop.eup %2667  ;;  %v1756_v61 = vld [vmem:[%s3379_s4 + $0x40] sm:$0xff] }
 0x622   :  { %v1363_v44 = vadd.f32 0.5, %v1362_v52  ;;  %v2670_v54 = vpop.eup %2669  ;;  %v2579_v52 = vpack.c.bf16 %v1755_v57, %v1754_v53 }
 0x623   :  { %v1365_v9 = vadd.f32 0.5, %v1364_v62  ;;  %v1366_v11 = vmul.f32 0.5, %v2670_v54  ;;  %v1762_v54 = vld [vmem:[%s3379_s4 + $0x70] sm:$0xff] }
 0x624   :  { %v1372_v48 = vmul.f32 %v2668_v6, %v1363_v44  ;;  %v1757_v44 = vld [vmem:[%s3379_s4 + $0x48] sm:$0xff]  ;;  %v1758_v6 = vld [vmem:[%s3379_s4 + $0x50] sm:$0xff] }
 0x625   :  { %v1371_v59 = vmul.f32 %v1369_v12, %v1365_v9  ;;  %v1367_v23 = vadd.f32 0.5, %v1366_v11  ;;  %v2582_v62 = vpack.c.bf16 %v1757_v44, %v1756_v61  ;;  %v1759_v9 = vld [vmem:[%s3379_s4 + $0x58] sm:$0xff] }
 0x626   :  { %v2585_v12 = vpack.c.bf16 %v1759_v9, %v1758_v6  ;;  %v1763_v11 = vld [vmem:[%s3379_s4 + $0x78] sm:$0xff] }
 0x627   :  { %v3227_v16 = vadd.f32 %v1372_v48, %v1371_v59  ;;  %v1760_v48 = vld [vmem:[%s3379_s4 + $0x60] sm:$0xff]  ;;  %v1761_v59 = vld [vmem:[%s3379_s4 + $0x68] sm:$0xff] }
 0x629   :  { %2671 = vtanh.f32 %v3227_v16 }
 0x633   :  { %v2672_v24 = vpop.eup %2671 }
 0x634   :  { %v1375_v8 = vmul.f32 %v2672_v24, %v1367_v23  ;;  %v2591_v23 = vpack.c.bf16 %v1763_v11, %v1762_v54  ;;  %v1842_v24 = vld [vmem:[%s3381_s6] sm:$0xff] }
 0x636   :  { %v1377_v18 = vrot.slane %v1375_v8, 5  ;;  %v3231_v30 = vsel %vm1742_vm5, %v3186_v29, %v1375_v8  ;;  %v1749_v29 = vld [vmem:[%s3379_s4 + $0x8] sm:$0xff]  ;;  %v1844_v8 = vld [vmem:[%s3381_s6 + $0x10] sm:$0xff] }
 0x637   :  { %v2570_v34 = vpack.c.bf16 %v1749_v29, %v1748_v46  ;;  %v1848_v29 = vld [vmem:[%s3381_s6 + $0x30] sm:$0xff] }
 0x638   :  { %1444 = vmatmul.mubr.f32.vlgmr.msra.gmra.mrb[14].mxu0 %v1377_v18  ;;  %1515 = vmatmul.mubr.f32.vlgmr.msra.gmra.mrb[14].mxu1 %v1377_v18 }
 0x639   :  { %2508 = vmatpush1.bf16.msra.mxu0 %v2851_v1  ;;  %2540 = vmatpush1.bf16.msra.mxu1 %v2854_v2 }
 0x63a   :  { %2510 = vmatprep.subr.bf16.mxu0 %v2856_v3  ;;  %2542 = vmatprep.subr.bf16.mxu1 %v2859_v7 }
 0x63b   :  { %1622 = vmatprep.mubr.f32.mxu0 %v2769_v0  ;;  %1693 = vmatprep.mubr.f32.mxu1 %v2769_v0 }
 0x63d   :  { %2512 = vmatpush1.bf16.msra.mxu0 %v2864_v13  ;;  %2544 = vmatpush1.bf16.msra.mxu1 %v2868_v14 }
 0x63e   :  { %2514 = vmatprep.subr.bf16.mxu0 %v2870_v15  ;;  %2546 = vmatprep.subr.bf16.mxu1 %v2873_v19 }
 0x641   :  { %2516 = vmatpush1.bf16.msra.mxu0 %v2878_v25  ;;  %2548 = vmatpush1.bf16.msra.mxu1 %v2882_v26 }
 0x642   :  { %2518 = vmatprep.subr.bf16.mxu0 %v2884_v27  ;;  %2550 = vmatprep.subr.bf16.mxu1 %v2887_v31 }
 0x645   :  { %2520 = vmatpush1.bf16.msra.mxu0 %v2890_v37  ;;  %2552 = vmatpush1.bf16.msra.mxu1 %v2894_v38 }
 0x646   :  { %2522 = vmatprep.subr.bf16.mxu0 %v2896_v39  ;;  %2554 = vmatprep.subr.bf16.mxu1 %v2899_v43 }
 0x649   :  { %2524 = vmatpush1.bf16.msra.mxu0 %v2902_v49  ;;  %2556 = vmatpush1.bf16.msra.mxu1 %v2906_v50 }
 0x64a   :  { %2526 = vmatprep.subr.bf16.mxu0 %v2908_v51  ;;  %2558 = vmatprep.subr.bf16.mxu1 %v2911_v56  ;;  %v1548_v56 = vrot.slane %v3227_v16, 7  ;;  %v2588_v16 = vpack.c.bf16 %v1761_v59, %v1760_v48 }
 0x64d   :  { %2528 = vmatpush1.bf16.msra.mxu0 %v2914_v63  ;;  %2560 = vmatpush1.bf16.msra.mxu1 %v2918_v4 }
 0x64e   :  { %2530 = vmatprep.subr.bf16.mxu0 %v2920_v5  ;;  %2562 = vmatprep.subr.bf16.mxu1 %v2923_v10 }
 0x651   :  { %2532 = vmatpush1.bf16.msra.mxu0 %v2926_v20  ;;  %2564 = vmatpush1.bf16.msra.mxu1 %v2930_v21 }
 0x652   :  { %2534 = vmatprep.subr.bf16.mxu0 %v2932_v22  ;;  %2566 = vmatprep.subr.bf16.mxu1 %v2935_v28 }
 0x655   :  { %2536 = vmatpush1.bf16.msra.mxu0 %v2938_v32  ;;  %2568 = vmatpush1.bf16.msra.mxu1 %v2942_v33 }
 0x656   :  { %2569 = vmatprep.subr.bf16.mxu0 %v2770_v35  ;;  %2593 = vmatprep.subr.bf16.mxu1 %v2770_v35 }
 0x70b   :  { %v1445_v1 = vpop.f32.mrb[14].mxu0  ;;  %v1516_v2 = vpop.f32.mrb[14].mxu1 }
 0x70c   :  { %v1525_v3 = vrot.slane %v1445_v1, 2  ;;  %v1527_v7 = vrot.slane %v1516_v2, 2  ;;  %v1447_v13 = vpop.f32.mrb[15].mxu0  ;;  %v1518_v14 = vpop.f32.mrb[15].mxu1  ;;  %v1846_v2 = vld [vmem:[%s3381_s6 + $0x20] sm:$0xff] }
 0x70d   :  { %v1526_v15 = vrot.slane %v1447_v13, 2  ;;  %v1528_v27 = vrot.slane %v1518_v14, 2 }
 0x70e   :  { %v1533_v19 = vadd.f32 %v1525_v3, %v2988_v55  ;;  %v1535_v26 = vadd.f32 %v1527_v7, %v2992_v60  ;;  %v1847_v3 = vld [vmem:[%s3381_s6 + $0x28] sm:$0xff] }
 0x70f   :  { %v1534_v25 = vadd.f32 %v1526_v15, %v2990_v58  ;;  %v1536_v31 = vadd.f32 %v1528_v27, %v2997_v17  ;;  %v2600_v7 = vpack.c.bf16 %v1847_v3, %v1846_v2 }
 0x710   :  { %2673 = vtanh.f32 %v1533_v19 }
 0x711   :  { %2675 = vtanh.f32 %v1534_v25 }
 0x712   :  { %2677 = vtanh.f32 %v1535_v26 }
 0x713   :  { %2679 = vtanh.f32 %v1536_v31 }
 0x71a   :  { %v2674_v37 = vpop.eup %2673 }
 0x71b   :  { %v1541_v38 = vmul.f32 0.5, %v2674_v37  ;;  %v2676_v39 = vpop.eup %2675 }
 0x71c   :  { %v1543_v49 = vmul.f32 0.5, %v2676_v39  ;;  %v2678_v50 = vpop.eup %2677 }
 0x71d   :  { %v1542_v43 = vadd.f32 0.5, %v1541_v38  ;;  %v2680_v10 = vpop.eup %2679 }
 0x71e   :  { %v1544_v51 = vadd.f32 0.5, %v1543_v49  ;;  %v1545_v20 = vmul.f32 0.5, %v2680_v10 }
 0x71f   :  { %v1551_v63 = vmul.f32 %v2678_v50, %v1542_v43 }
 0x720   :  { %v1550_v4 = vmul.f32 %v1548_v56, %v1544_v51  ;;  %v1546_v21 = vadd.f32 0.5, %v1545_v20 }
 0x722   :  { %v3270_v5 = vadd.f32 %v1551_v63, %v1550_v4 }
 0x724   :  { %2681 = vtanh.f32 %v3270_v5 }
 0x72e   :  { %v2682_v22 = vpop.eup %2681 }
 0x72f   :  { %v1554_v28 = vmul.f32 %v2682_v22, %v1546_v21 }
 0x731   :  { %v1556_v32 = vrot.slane %v1554_v28, 6  ;;  %v3274_v33 = vsel %vm1744_vm6, %v3231_v30, %v1554_v28  ;;  %v1845_v30 = vld [vmem:[%s3381_s6 + $0x18] sm:$0xff] }
 0x732   :  { %v2597_v1 = vpack.c.bf16 %v1845_v30, %v1844_v8 }
 0x733   :  { %1623 = vmatmul.mubr.f32.vlgmr.msra.gmra.mrb[16].mxu0 %v1556_v32  ;;  %1694 = vmatmul.mubr.f32.vlgmr.msra.gmra.mrb[16].mxu1 %v1556_v32 }
 0x734   :  { %2571 = vmatpush3.bf16.msra.mxu0 %v2570_v34  ;;  %2003 = vmatprep.mubr.msk.f32.mxu0 %vm2771_vm7, %v2769_v0 }
 0x735   :  { %2572 = vmatprep.subr.bf16.mxu0 %v2770_v35  ;;  %2022 = vmatprep.mubr.msk.f32.mxu1 %vm2771_vm7, %v2769_v0  ;;  %v1843_v0 = vld [vmem:[%s3381_s6 + $0x8] sm:$0xff] }
 0x736   :  { %v2594_v18 = vpack.c.bf16 %v1843_v0, %v1842_v24 }
 0x738   :  { %2574 = vmatpush3.bf16.msra.mxu0 %v2573_v42  ;;  %2595 = vmatpush3.bf16.msra.mxu1 %v2594_v18 }
 0x739   :  { %2575 = vmatprep.subr.bf16.mxu0 %v2770_v35  ;;  %2596 = vmatprep.subr.bf16.mxu1 %v2770_v35 }
 0x73c   :  { %2577 = vmatpush3.bf16.msra.mxu0 %v2576_v47  ;;  %2598 = vmatpush3.bf16.msra.mxu1 %v2597_v1 }
 0x73d   :  { %2578 = vmatprep.subr.bf16.mxu0 %v2770_v35  ;;  %2599 = vmatprep.subr.bf16.mxu1 %v2770_v35 }
 0x740   :  { %2580 = vmatpush3.bf16.msra.mxu0 %v2579_v52  ;;  %2601 = vmatpush3.bf16.msra.mxu1 %v2600_v7 }
 0x741   :  { %2581 = vmatprep.subr.bf16.mxu0 %v2770_v35  ;;  %2602 = vmatprep.subr.bf16.mxu1 %v2770_v35 }
 0x744   :  { %2583 = vmatpush3.bf16.msra.mxu0 %v2582_v62 }
 0x745   :  { %2584 = vmatprep.subr.bf16.mxu0 %v2770_v35 }
 0x748   :  { %2586 = vmatpush3.bf16.msra.mxu0 %v2585_v12 }
 0x749   :  { %2587 = vmatprep.subr.bf16.mxu0 %v2770_v35 }
 0x74c   :  { %2589 = vmatpush3.bf16.msra.mxu0 %v2588_v16 }
 0x74d   :  { %2590 = vmatprep.subr.bf16.mxu0 %v2770_v35  ;;  %v1943_v35 = vld [vmem:[%s3380_s5] ss:$0 sm:$0xff] }
 0x750   :  { %2592 = vmatpush3.bf16.msra.mxu0 %v2591_v23 }
 0x806   :  { %v1624_v13 = vpop.f32.mrb[16].mxu0  ;;  %v1695_v14 = vpop.f32.mrb[16].mxu1 }
 0x807   :  { %v1704_v15 = vrot.slane %v1624_v13, 1  ;;  %v1706_v19 = vrot.slane %v1695_v14, 1  ;;  %v1626_v25 = vpop.f32.mrb[17].mxu0  ;;  %v1697_v26 = vpop.f32.mrb[17].mxu1 }
 0x808   :  { %v1705_v27 = vrot.slane %v1626_v25, 1  ;;  %v1707_v39 = vrot.slane %v1697_v26, 1 }
 0x809   :  { %v1712_v31 = vadd.f32 %v1704_v15, %v2988_v55  ;;  %v1714_v38 = vadd.f32 %v1706_v19, %v2992_v60  ;;  %v1727_v55 = vrot.slane %v3270_v5, 7  ;;  %v1849_v5 = vld [vmem:[%s3381_s6 + $0x38] sm:$0xff]  ;;  %s2737_s6 = scalar_lea.vmem %s1932_s2, 128 }
 0x80a   :  { %v1713_v37 = vadd.f32 %v1705_v27, %v2990_v58  ;;  %v1715_v43 = vadd.f32 %v1707_v39, %v2997_v17  ;;  %v2603_v34 = vpack.c.bf16 %v1849_v5, %v1848_v29  ;;  %p2738_p2 = scmp.ne.s32.totalorder %s1932_s2, %s2737_s6  ;;  %p2743_p4 = scmp.lt.s32.totalorder %s2737_s6, %s2737_s6 }
 0x80b   :  { %2683 = vtanh.f32 %v1712_v31 }
 0x80c   :  { %2685 = vtanh.f32 %v1713_v37  ;;  %2604 = vmatpush3.bf16.msra.mxu1 %v2603_v34  ;;  %p2744_p5 = por %p2743_p4, %p2742_p3 }
 0x80d   :  { %2687 = vtanh.f32 %v1714_v38 }
 0x80e   :  { %2689 = vtanh.f32 %v1715_v43  ;;  %p2745_p6 = pnand %p2744_p5, %p2738_p2 }
 0x815   :  { %v2684_v49 = vpop.eup %2683 }
 0x816   :  { %v1720_v50 = vmul.f32 0.5, %v2684_v49  ;;  %v2686_v51 = vpop.eup %2685 }
 0x817   :  { %v1722_v63 = vmul.f32 0.5, %v2686_v51  ;;  %v2688_v4 = vpop.eup %2687 }
 0x818   :  { %v1721_v56 = vadd.f32 0.5, %v1720_v50  ;;  %v2690_v60 = vpop.eup %2689 }
 0x819   :  { %v1723_v10 = vadd.f32 0.5, %v1722_v63  ;;  %v1724_v22 = vmul.f32 0.5, %v2690_v60 }
 0x81a   :  { %v1730_v20 = vmul.f32 %v2688_v4, %v1721_v56 }
 0x81b   :  { %v1729_v58 = vmul.f32 %v1727_v55, %v1723_v10  ;;  %v1725_v28 = vadd.f32 0.5, %v1724_v22 }
 0x81d   :  { %v1731_v21 = vadd.f32 %v1730_v20, %v1729_v58 }
 0x81f   :  { %2691 = vtanh.f32 %v1731_v21 }
 0x829   :  { %v2692_v32 = vpop.eup %2691 }
 0x82a   :  { %v1733_v17 = vmul.f32 %v2692_v32, %v1725_v28 }
 0x82c   :  { %v1747_v46 = vsel %vm1746_vm8, %v3274_v33, %v1733_v17  ;;  %v1841_v33 = vld [vmem:[%s3382_s7] sm:$0xff] }
 0x82d   :  { %2004 = vmatmul.mubr.f32.vlgmr.msra.gmra.mrb[18].mxu0 %v1747_v46 }
 0x900   :  { %v1837_v36 = vpop.f32.mrb[18].mxu0 }
 0x901   :  { %v1838_v41 = vadd.f32 %v1943_v35, %v1837_v36  ;;  %v2005_v42 = vpop.f32.mrb[19].mxu0 }
 0x903   :  { %2023 = vmatmul.mubr.msk.f32.vlgmr.msra.gmra.mrb[18].mxu1 %vm113_vm0, %v1838_v41 }
 0x9d6   :  { %v1919_v45 = vpop.f32.mrb[18].mxu1 }
 0x9d7   :  { %v1923_v40 = vadd.f32 %v1919_v45, %v1841_v33  ;;  %v2024_v47 = vpop.f32.mrb[19].mxu1 }
 0x9d9   :  { %1924 = vst [vmem:[#allocation7] sm:$0xff] %v1923_v40 }
 0x9da   :  { %2748 = shalt.err (!%p2745_p6)
}
 0x9db   :  { %s2749_s11 = scalar_lea.hbm %s3383_s8, 128 }
 0x9dc   :  { %p2750_p7 = scmp.ne.s32.totalorder %s3383_s8, %s2749_s11  ;;  %p2753_p8 = scmp.lt.u32.totalorder %s2749_s11, %s3383_s8 }
 0x9de   :  { %p2755_p9 = pnand %p2753_p8, %p2750_p7 }
 0x9e0   :  { %2758 = shalt.err (!%p2755_p9)
}
 0x9e1   :  { %1934 = dma.vmem_to_hbm [thread:$0]  %s1932_s2, 128, %s3383_s8, [#allocation4]  }
 0x9e2   :  { %2763 = dma.done.wait [#allocation4], 128  }
 0x9e3   :  { %2764 = vsyncadd [#allocation4], 4294967168 }
 0x9e4   :  { %1938 = vsyncpa [#allocation3], 1 }
 0x9e5   :  { %1939 = vsyncpa [#allocation6], 1 }
 0x9e6   :  { %1940 = vsyncpa [#allocation4], 1 }

</bundles_post_ra>
